<compile_context>
chip_gen: v5e
topology: v5e:2x2
jax: 0.10.0
libtpu: 0.0.40
codegen_flags: <defaults>
</compile_context>

<pallas_src>
import jax
import jax.numpy as jnp
from jax import lax
from jax.experimental import pallas as pl
from jax.experimental.pallas import tpu as pltpu


def _make_lstm_kernel(num_layers, T, Bp, H):
    """Builds a Pallas kernel for a `num_layers` stacked LSTM + (folded BN) + MLP head."""

    def kernel(*refs):
        x_ref = refs[0]                       # (T*Bp, D)  time-major, batch-padded, 2-D
        idx = 1
        layers = []
        for _ in range(num_layers):
            layers.append((refs[idx], refs[idx + 1], refs[idx + 2]))
            idx += 3
        fc1w_ref, fc1b_ref, fc2w_ref, fc2b_ref = refs[idx:idx + 4]; idx += 4
        out_ref = refs[idx]; idx += 1         # (Bp, F) output
        xproj_ref = refs[idx]; idx += 1       # VMEM scratch (T*Bp, 4H): batched input proj
        seq_ref = refs[idx] if num_layers > 1 else None   # VMEM scratch (T*Bp, H)

        zeros_state = jnp.zeros((Bp, H), jnp.float32)     # shared h0/c0

        # Hoisted lane constants, shared by every layer and every timestep.
        # sigmoid(x) = 0.5 * tanh(x / 2) + 0.5  -> only one transcendental per
        # step over the full 4H = 128-lane gate vreg; lanes [2H, 3H) (the g
        # gate) keep plain tanh (pre/post scale 1, shift 0).
        lanes = lax.broadcasted_iota(jnp.int32, (1, 4 * H), 1)
        g_band = (lanes >= 2 * H) & (lanes < 3 * H)
        pre_scale = jnp.where(g_band, 1.0, 0.5)            # folded into xproj / w_hh
        post_scale = jnp.where(g_band, 1.0, 0.5)
        post_shift = jnp.where(g_band, 0.0, 0.5)

        h_last = None
        for l, (wih_ref, whh_ref, b_ref) in enumerate(layers):
            # Fold the sigmoid pre-scale into the recurrent weights once per
            # layer (one (H, 4H) VPU mul) instead of once per timestep.
            w_hh = whh_ref[...] * pre_scale                 # (H, 4H)
            src = x_ref[...] if l == 0 else seq_ref[...]    # (T*Bp, in_dim)

            # Batched input projection for ALL timesteps of this layer at once,
            # with bias and the gate pre-scale folded in.
            xproj_ref[...] = (jnp.dot(src, wih_ref[...],
                                      preferred_element_type=jnp.float32)
                              + b_ref[...]) * pre_scale      # (T*Bp, 4H)

            write_seq = l < num_layers - 1

            def step(t, carry, w_hh=w_hh, write_seq=write_seq):
                h, c = carry
                base = pl.multiple_of(t * Bp, Bp)
                gates = (xproj_ref[pl.ds(base, Bp), :]
                         + jnp.dot(h, w_hh, preferred_element_type=jnp.float32))  # (Bp, 4H)

                # One EUP tanh over the whole 128-lane tile, then a single FMA
                # turns the sigmoid bands into sigmoids.
                act = jnp.tanh(gates) * post_scale + post_shift

                i_g = act[:, 0 * H:1 * H]
                f_g = act[:, 1 * H:2 * H]
                g_g = act[:, 2 * H:3 * H]
                o_g = act[:, 3 * H:4 * H]
                c_new = f_g * c + i_g * g_g
                h_new = o_g * jnp.tanh(c_new)
                if write_seq:
                    seq_ref[pl.ds(base, Bp), :] = h_new   # feed next layer at timestep t
                return (h_new, c_new)

            # T is static and small: unroll so the LLO scheduler can overlap
            # the MXU push / EUP / VPU work across timesteps.
            h_last, _ = lax.fori_loop(0, T, step, (zeros_state, zeros_state),
                                      unroll=True)
            # TODO(synk): inter-layer LSTM dropout (p=0.2) is train-time only; eval == identity.

        # out[:, -1, :] == h_last of the top layer.
        # BatchNorm1d folded into fc1 in the wrapper; Dropout(0.3) = identity (eval).
        z = jnp.maximum(
            jnp.dot(h_last, fc1w_ref[...], preferred_element_type=jnp.float32)
            + fc1b_ref[...], 0.0)
        out_ref[...] = (jnp.dot(z, fc2w_ref[...], preferred_element_type=jnp.float32)
                        + fc2b_ref[...])

    return kernel


def lstm_forward(x, params, *, hidden_size, output_size, ahead, num_layers):
    """x: (B, T, input_size) batch-first, like the PyTorch module."""
    B, T, D = x.shape
    H = hidden_size
    F = output_size * ahead
    Bp = ((B + 7) // 8) * 8                                   # pad batch to f32 sublane multiple

    x_tm = jnp.transpose(x, (1, 0, 2)).astype(jnp.float32)    # (T, B, D) time-major
    x_p = jnp.pad(x_tm, ((0, 0), (0, Bp - B), (0, 0)))        # (T, Bp, D)
    x2d = x_p.reshape(T * Bp, D)                              # layout for batched input proj

    # Fold eval-mode BatchNorm1d into fc1 (pure wrapper-side constant fold).
    eps = 1e-5
    scale = params["bn_gamma"] * lax.rsqrt(params["bn_var"] + eps)          # (1, H)
    fc1_w_eff = params["fc1_w"] * scale.reshape(H, 1)                        # diag(s) @ W1
    fc1_b_eff = (params["fc1_b"]
                 + (params["bn_beta"] - params["bn_mean"] * scale) @ params["fc1_w"])

    flat = [x2d]
    for l in range(num_layers):
        w_ih, w_hh, b = params["lstm"][l]
        flat += [w_ih, w_hh, b]
    flat += [fc1_w_eff, fc1_b_eff, params["fc2_w"], params["fc2_b"]]

    scratch = [pltpu.VMEM((T * Bp, 4 * H), jnp.float32)]      # batched input projection
    if num_layers > 1:
        scratch.append(pltpu.VMEM((T * Bp, H), jnp.float32))  # inter-layer sequence

    kernel = _make_lstm_kernel(num_layers, T, Bp, H)
    vmem = pl.BlockSpec(memory_space=pltpu.MemorySpace.VMEM)  # whole small arrays in VMEM
    out = pl.pallas_call(
        kernel,
        out_shape=jax.ShapeDtypeStruct((Bp, F), jnp.float32),
        in_specs=[vmem] * len(flat),
        out_specs=vmem,
        scratch_shapes=scratch,
    )(*flat)
    return out[:B].reshape(B, ahead, output_size)


def init_params(key, input_size, hidden_size, output_size, num_layers, ahead):
    H = hidden_size
    F = output_size * ahead
    k_lstm = 1.0 / float(H) ** 0.5
    keys = jax.random.split(key, 4 * num_layers + 4)
    ki = 0
    lstm = []
    for l in range(num_layers):
        in_dim = input_size if l == 0 else H
        w_ih = jax.random.uniform(keys[ki], (in_dim, 4 * H), jnp.float32, -k_lstm, k_lstm); ki += 1
        w_hh = jax.random.uniform(keys[ki], (H, 4 * H), jnp.float32, -k_lstm, k_lstm); ki += 1
        b_ih = jax.random.uniform(keys[ki], (1, 4 * H), jnp.float32, -k_lstm, k_lstm); ki += 1
        b_hh = jax.random.uniform(keys[ki], (1, 4 * H), jnp.float32, -k_lstm, k_lstm); ki += 1
        lstm.append((w_ih, w_hh, b_ih + b_hh))
    k_fc1 = 1.0 / float(H) ** 0.5
    fc1_w = jax.random.uniform(keys[ki], (H, H), jnp.float32, -k_fc1, k_fc1); ki += 1
    fc1_b = jax.random.uniform(keys[ki], (1, H), jnp.float32, -k_fc1, k_fc1); ki += 1
    fc2_w = jax.random.uniform(keys[ki], (H, F), jnp.float32, -k_fc1, k_fc1); ki += 1
    fc2_b = jax.random.uniform(keys[ki], (1, F), jnp.float32, -k_fc1, k_fc1); ki += 1
    return {
        "lstm": lstm,
        "bn_gamma": jnp.ones((1, H), jnp.float32),
        "bn_beta": jnp.zeros((1, H), jnp.float32),
        "bn_mean": jnp.zeros((1, H), jnp.float32),
        "bn_var": jnp.ones((1, H), jnp.float32),
        "fc1_w": fc1_w, "fc1_b": fc1_b, "fc2_w": fc2_w, "fc2_b": fc2_b,
    }


def reference_forward(x, params, *, hidden_size, output_size, ahead, num_layers):
    """Pure-JAX reference mirroring PyTorch eval-mode semantics (explicit BN)."""
    B, T, D = x.shape
    H = hidden_size
    seq = x.astype(jnp.float32)
    for l in range(num_layers):
        w_ih, w_hh, b = params["lstm"][l]
        h = jnp.zeros((B, H), jnp.float32)
        c = jnp.zeros((B, H), jnp.float32)
        outs = []
        for t in range(T):
            gates = seq[:, t, :] @ w_ih + h @ w_hh + b
            i_g = jax.nn.sigmoid(gates[:, 0 * H:1 * H])
            f_g = jax.nn.sigmoid(gates[:, 1 * H:2 * H])
            g_g = jnp.tanh(gates[:, 2 * H:3 * H])
            o_g = jax.nn.sigmoid(gates[:, 3 * H:4 * H])
            c = f_g * c + i_g * g_g
            h = o_g * jnp.tanh(c)
            outs.append(h)
        seq = jnp.stack(outs, axis=1)
    y = (seq[:, -1, :] - params["bn_mean"]) / jnp.sqrt(params["bn_var"] + 1e-5)
    y = y * params["bn_gamma"] + params["bn_beta"]
    z = jnp.maximum(y @ params["fc1_w"] + params["fc1_b"], 0.0)
    out = z @ params["fc2_w"] + params["fc2_b"]
    return out.reshape(B, ahead, output_size)


if __name__ == "__main__":
    # Small shapes consistent with the module's forward:
    batch, seq_len, input_size = 2, 8, 4
    hidden_size, output_size, num_layers, ahead = 32, 2, 2, 3

    key = jax.random.PRNGKey(0)
    k_x, k_p = jax.random.split(key)
    x = jax.random.normal(k_x, (batch, seq_len, input_size), jnp.float32)
    params = init_params(k_p, input_size, hidden_size, output_size, num_layers, ahead)

    out = lstm_forward(x, params, hidden_size=hidden_size, output_size=output_size,
                       ahead=ahead, num_layers=num_layers)
    out = jax.block_until_ready(out)
    assert out.shape == (batch, ahead, output_size), out.shape

    ref = reference_forward(x, params, hidden_size=hidden_size, output_size=output_size,
                            ahead=ahead, num_layers=num_layers)
    assert jnp.allclose(out, ref, atol=1e-4, rtol=1e-4), float(jnp.abs(out - ref).max())

    print("KERNEL_OK")
</pallas_src>

<mosaic_0001>
module attributes {stable_mosaic.version = 11 : i64} {
  func.func @kernel(%arg0: memref<64x4xf32, #tpu.memory_space<vmem>>, %arg1: memref<4x128xf32, #tpu.memory_space<vmem>>, %arg2: memref<32x128xf32, #tpu.memory_space<vmem>>, %arg3: memref<1x128xf32, #tpu.memory_space<vmem>>, %arg4: memref<32x128xf32, #tpu.memory_space<vmem>>, %arg5: memref<32x128xf32, #tpu.memory_space<vmem>>, %arg6: memref<1x128xf32, #tpu.memory_space<vmem>>, %arg7: memref<32x32xf32, #tpu.memory_space<vmem>>, %arg8: memref<1x32xf32, #tpu.memory_space<vmem>>, %arg9: memref<32x6xf32, #tpu.memory_space<vmem>>, %arg10: memref<1x6xf32, #tpu.memory_space<vmem>>, %arg11: memref<8x6xf32, #tpu.memory_space<vmem>>, %arg12: memref<64x128xf32, #tpu.memory_space<vmem>>, %arg13: memref<64x32xf32, #tpu.memory_space<vmem>>) attributes {dimension_semantics = [], scalar_prefetch = 0 : i64, scratch_operands = 2 : i64, tpu.core_type = #tpu.core_type<tc>} {
    %cst = arith.constant 0.000000e+00 : f32
    %0 = vector.broadcast %cst : f32 to vector<8x32xf32>
    %1 = tpu.iota {dimensions = array<i32: 1>} : vector<1x128xi32>
    %c64_i32 = arith.constant 64 : i32
    %2 = vector.broadcast %c64_i32 : i32 to vector<1x128xi32>
    %3 = arith.cmpi sge, %1, %2 : vector<1x128xi32>
    %c96_i32 = arith.constant 96 : i32
    %4 = vector.broadcast %c96_i32 : i32 to vector<1x128xi32>
    %5 = arith.cmpi slt, %1, %4 : vector<1x128xi32>
    %6 = arith.andi %3, %5 : vector<1x128xi1>
    %cst_0 = arith.constant 1.000000e+00 : f32
    %cst_1 = arith.constant 5.000000e-01 : f32
    %7 = vector.broadcast %cst_0 : f32 to vector<1x128xf32>
    %8 = vector.broadcast %cst_1 : f32 to vector<1x128xf32>
    %9 = arith.select %6, %7, %8 : vector<1x128xi1>, vector<1x128xf32>
    %cst_2 = arith.constant 1.000000e+00 : f32
    %cst_3 = arith.constant 5.000000e-01 : f32
    %10 = vector.broadcast %cst_2 : f32 to vector<1x128xf32>
    %11 = vector.broadcast %cst_3 : f32 to vector<1x128xf32>
    %12 = arith.select %6, %10, %11 : vector<1x128xi1>, vector<1x128xf32>
    %cst_4 = arith.constant 0.000000e+00 : f32
    %cst_5 = arith.constant 5.000000e-01 : f32
    %13 = vector.broadcast %cst_4 : f32 to vector<1x128xf32>
    %14 = vector.broadcast %cst_5 : f32 to vector<1x128xf32>
    %15 = arith.select %6, %13, %14 : vector<1x128xi1>, vector<1x128xf32>
    %c0 = arith.constant 0 : index
    %c0_6 = arith.constant 0 : index
    %16 = vector.load %arg2[%c0, %c0_6] : memref<32x128xf32, #tpu.memory_space<vmem>>, vector<32x128xf32>
    %17 = vector.broadcast %9 : vector<1x128xf32> to vector<32x128xf32>
    %18 = arith.mulf %16, %17 : vector<32x128xf32>
    %c0_7 = arith.constant 0 : index
    %c0_8 = arith.constant 0 : index
    %19 = vector.load %arg0[%c0_7, %c0_8] : memref<64x4xf32, #tpu.memory_space<vmem>>, vector<64x4xf32>
    %c0_9 = arith.constant 0 : index
    %c0_10 = arith.constant 0 : index
    %20 = vector.load %arg1[%c0_9, %c0_10] : memref<4x128xf32, #tpu.memory_space<vmem>>, vector<4x128xf32>
    %cst_11 = arith.constant dense<0.000000e+00> : vector<64x128xf32>
    %21 = tpu.matmul %19, %20, %cst_11 {dimension_numbers = #tpu.dot_dimension_numbers<[1], [0], [0], [1], [0, 0, 1, 1], [], []>} : vector<64x4xf32>, vector<4x128xf32>, vector<64x128xf32> -> vector<64x128xf32>
    %c0_12 = arith.constant 0 : index
    %c0_13 = arith.constant 0 : index
    %22 = vector.load %arg3[%c0_12, %c0_13] : memref<1x128xf32, #tpu.memory_space<vmem>>, vector<1x128xf32>
    %23 = vector.broadcast %22 : vector<1x128xf32> to vector<64x128xf32>
    %24 = arith.addf %21, %23 : vector<64x128xf32>
    %25 = vector.broadcast %9 : vector<1x128xf32> to vector<64x128xf32>
    %26 = arith.mulf %24, %25 : vector<64x128xf32>
    %c0_14 = arith.constant 0 : index
    %c0_15 = arith.constant 0 : index
    %27 = vector.load %arg12[%c0_14, %c0_15] : memref<64x128xf32, #tpu.memory_space<vmem>>, vector<64x128xf32>
    tpu.vector_store %arg12[%c0_14, %c0_15], %26 {strides = array<i32>} : memref<64x128xf32, #tpu.memory_space<vmem>>, vector<64x128xf32>,
    %c0_i32 = arith.constant 0 : i32
    %c8_i32 = arith.constant 8 : i32
    %28 = arith.muli %c0_i32, %c8_i32 : i32
    %29 = tpu.assume_multiple %28, 8 : i32
    %30 = arith.index_cast %29 : i32 to index
    %c0_16 = arith.constant 0 : index
    %31 = vector.load %arg12[%30, %c0_16] : memref<64x128xf32, #tpu.memory_space<vmem>>, vector<8x128xf32>
    %cst_17 = arith.constant dense<0.000000e+00> : vector<8x128xf32>
    %32 = tpu.matmul %0, %18, %cst_17 {dimension_numbers = #tpu.dot_dimension_numbers<[1], [0], [0], [1], [0, 0, 1, 1], [], []>} : vector<8x32xf32>, vector<32x128xf32>, vector<8x128xf32> -> vector<8x128xf32>
    %33 = arith.addf %31, %32 : vector<8x128xf32>
    %34 = math.tanh %33 : vector<8x128xf32>
    %35 = vector.broadcast %12 : vector<1x128xf32> to vector<8x128xf32>
    %36 = arith.mulf %34, %35 : vector<8x128xf32>
    %37 = vector.broadcast %15 : vector<1x128xf32> to vector<8x128xf32>
    %38 = arith.addf %36, %37 : vector<8x128xf32>
    %39 = vector.extract_strided_slice %38 {offsets = [0, 0], sizes = [8, 32], strides = [1, 1]} : vector<8x128xf32> to vector<8x32xf32>
    %40 = vector.extract_strided_slice %38 {offsets = [0, 32], sizes = [8, 32], strides = [1, 1]} : vector<8x128xf32> to vector<8x32xf32>
    %41 = vector.extract_strided_slice %38 {offsets = [0, 64], sizes = [8, 32], strides = [1, 1]} : vector<8x128xf32> to vector<8x32xf32>
    %42 = vector.extract_strided_slice %38 {offsets = [0, 96], sizes = [8, 32], strides = [1, 1]} : vector<8x128xf32> to vector<8x32xf32>
    %43 = arith.mulf %40, %0 : vector<8x32xf32>
    %44 = arith.mulf %39, %41 : vector<8x32xf32>
    %45 = arith.addf %43, %44 : vector<8x32xf32>
    %46 = math.tanh %45 : vector<8x32xf32>
    %47 = arith.mulf %42, %46 : vector<8x32xf32>
    %48 = arith.index_cast %29 : i32 to index
    %c0_18 = arith.constant 0 : index
    %49 = vector.load %arg13[%48, %c0_18] : memref<64x32xf32, #tpu.memory_space<vmem>>, vector<8x32xf32>
    tpu.vector_store %arg13[%48, %c0_18], %47 {strides = array<i32>} : memref<64x32xf32, #tpu.memory_space<vmem>>, vector<8x32xf32>,
    %c1_i32 = arith.constant 1 : i32
    %c8_i32_19 = arith.constant 8 : i32
    %50 = arith.muli %c1_i32, %c8_i32_19 : i32
    %51 = tpu.assume_multiple %50, 8 : i32
    %52 = arith.index_cast %51 : i32 to index
    %c0_20 = arith.constant 0 : index
    %53 = vector.load %arg12[%52, %c0_20] : memref<64x128xf32, #tpu.memory_space<vmem>>, vector<8x128xf32>
    %cst_21 = arith.constant dense<0.000000e+00> : vector<8x128xf32>
    %54 = tpu.matmul %47, %18, %cst_21 {dimension_numbers = #tpu.dot_dimension_numbers<[1], [0], [0], [1], [0, 0, 1, 1], [], []>} : vector<8x32xf32>, vector<32x128xf32>, vector<8x128xf32> -> vector<8x128xf32>
    %55 = arith.addf %53, %54 : vector<8x128xf32>
    %56 = math.tanh %55 : vector<8x128xf32>
    %57 = vector.broadcast %12 : vector<1x128xf32> to vector<8x128xf32>
    %58 = arith.mulf %56, %57 : vector<8x128xf32>
    %59 = vector.broadcast %15 : vector<1x128xf32> to vector<8x128xf32>
    %60 = arith.addf %58, %59 : vector<8x128xf32>
    %61 = vector.extract_strided_slice %60 {offsets = [0, 0], sizes = [8, 32], strides = [1, 1]} : vector<8x128xf32> to vector<8x32xf32>
    %62 = vector.extract_strided_slice %60 {offsets = [0, 32], sizes = [8, 32], strides = [1, 1]} : vector<8x128xf32> to vector<8x32xf32>
    %63 = vector.extract_strided_slice %60 {offsets = [0, 64], sizes = [8, 32], strides = [1, 1]} : vector<8x128xf32> to vector<8x32xf32>
    %64 = vector.extract_strided_slice %60 {offsets = [0, 96], sizes = [8, 32], strides = [1, 1]} : vector<8x128xf32> to vector<8x32xf32>
    %65 = arith.mulf %62, %45 : vector<8x32xf32>
    %66 = arith.mulf %61, %63 : vector<8x32xf32>
    %67 = arith.addf %65, %66 : vector<8x32xf32>
    %68 = math.tanh %67 : vector<8x32xf32>
    %69 = arith.mulf %64, %68 : vector<8x32xf32>
    %70 = arith.index_cast %51 : i32 to index
    %c0_22 = arith.constant 0 : index
    %71 = vector.load %arg13[%70, %c0_22] : memref<64x32xf32, #tpu.memory_space<vmem>>, vector<8x32xf32>
    tpu.vector_store %arg13[%70, %c0_22], %69 {strides = array<i32>} : memref<64x32xf32, #tpu.memory_space<vmem>>, vector<8x32xf32>,
    %c2_i32 = arith.constant 2 : i32
    %c8_i32_23 = arith.constant 8 : i32
    %72 = arith.muli %c2_i32, %c8_i32_23 : i32
    %73 = tpu.assume_multiple %72, 8 : i32
    %74 = arith.index_cast %73 : i32 to index
    %c0_24 = arith.constant 0 : index
    %75 = vector.load %arg12[%74, %c0_24] : memref<64x128xf32, #tpu.memory_space<vmem>>, vector<8x128xf32>
    %cst_25 = arith.constant dense<0.000000e+00> : vector<8x128xf32>
    %76 = tpu.matmul %69, %18, %cst_25 {dimension_numbers = #tpu.dot_dimension_numbers<[1], [0], [0], [1], [0, 0, 1, 1], [], []>} : vector<8x32xf32>, vector<32x128xf32>, vector<8x128xf32> -> vector<8x128xf32>
    %77 = arith.addf %75, %76 : vector<8x128xf32>
    %78 = math.tanh %77 : vector<8x128xf32>
    %79 = vector.broadcast %12 : vector<1x128xf32> to vector<8x128xf32>
    %80 = arith.mulf %78, %79 : vector<8x128xf32>
    %81 = vector.broadcast %15 : vector<1x128xf32> to vector<8x128xf32>
    %82 = arith.addf %80, %81 : vector<8x128xf32>
    %83 = vector.extract_strided_slice %82 {offsets = [0, 0], sizes = [8, 32], strides = [1, 1]} : vector<8x128xf32> to vector<8x32xf32>
    %84 = vector.extract_strided_slice %82 {offsets = [0, 32], sizes = [8, 32], strides = [1, 1]} : vector<8x128xf32> to vector<8x32xf32>
    %85 = vector.extract_strided_slice %82 {offsets = [0, 64], sizes = [8, 32], strides = [1, 1]} : vector<8x128xf32> to vector<8x32xf32>
    %86 = vector.extract_strided_slice %82 {offsets = [0, 96], sizes = [8, 32], strides = [1, 1]} : vector<8x128xf32> to vector<8x32xf32>
    %87 = arith.mulf %84, %67 : vector<8x32xf32>
    %88 = arith.mulf %83, %85 : vector<8x32xf32>
    %89 = arith.addf %87, %88 : vector<8x32xf32>
    %90 = math.tanh %89 : vector<8x32xf32>
    %91 = arith.mulf %86, %90 : vector<8x32xf32>
    %92 = arith.index_cast %73 : i32 to index
    %c0_26 = arith.constant 0 : index
    %93 = vector.load %arg13[%92, %c0_26] : memref<64x32xf32, #tpu.memory_space<vmem>>, vector<8x32xf32>
    tpu.vector_store %arg13[%92, %c0_26], %91 {strides = array<i32>} : memref<64x32xf32, #tpu.memory_space<vmem>>, vector<8x32xf32>,
    %c3_i32 = arith.constant 3 : i32
    %c8_i32_27 = arith.constant 8 : i32
    %94 = arith.muli %c3_i32, %c8_i32_27 : i32
    %95 = tpu.assume_multiple %94, 8 : i32
    %96 = arith.index_cast %95 : i32 to index
    %c0_28 = arith.constant 0 : index
    %97 = vector.load %arg12[%96, %c0_28] : memref<64x128xf32, #tpu.memory_space<vmem>>, vector<8x128xf32>
    %cst_29 = arith.constant dense<0.000000e+00> : vector<8x128xf32>
    %98 = tpu.matmul %91, %18, %cst_29 {dimension_numbers = #tpu.dot_dimension_numbers<[1], [0], [0], [1], [0, 0, 1, 1], [], []>} : vector<8x32xf32>, vector<32x128xf32>, vector<8x128xf32> -> vector<8x128xf32>
    %99 = arith.addf %97, %98 : vector<8x128xf32>
    %100 = math.tanh %99 : vector<8x128xf32>
    %101 = vector.broadcast %12 : vector<1x128xf32> to vector<8x128xf32>
    %102 = arith.mulf %100, %101 : vector<8x128xf32>
    %103 = vector.broadcast %15 : vector<1x128xf32> to vector<8x128xf32>
    %104 = arith.addf %102, %103 : vector<8x128xf32>
    %105 = vector.extract_strided_slice %104 {offsets = [0, 0], sizes = [8, 32], strides = [1, 1]} : vector<8x128xf32> to vector<8x32xf32>
    %106 = vector.extract_strided_slice %104 {offsets = [0, 32], sizes = [8, 32], strides = [1, 1]} : vector<8x128xf32> to vector<8x32xf32>
    %107 = vector.extract_strided_slice %104 {offsets = [0, 64], sizes = [8, 32], strides = [1, 1]} : vector<8x128xf32> to vector<8x32xf32>
    %108 = vector.extract_strided_slice %104 {offsets = [0, 96], sizes = [8, 32], strides = [1, 1]} : vector<8x128xf32> to vector<8x32xf32>
    %109 = arith.mulf %106, %89 : vector<8x32xf32>
    %110 = arith.mulf %105, %107 : vector<8x32xf32>
    %111 = arith.addf %109, %110 : vector<8x32xf32>
    %112 = math.tanh %111 : vector<8x32xf32>
    %113 = arith.mulf %108, %112 : vector<8x32xf32>
    %114 = arith.index_cast %95 : i32 to index
    %c0_30 = arith.constant 0 : index
    %115 = vector.load %arg13[%114, %c0_30] : memref<64x32xf32, #tpu.memory_space<vmem>>, vector<8x32xf32>
    tpu.vector_store %arg13[%114, %c0_30], %113 {strides = array<i32>} : memref<64x32xf32, #tpu.memory_space<vmem>>, vector<8x32xf32>,
    %c4_i32 = arith.constant 4 : i32
    %c8_i32_31 = arith.constant 8 : i32
    %116 = arith.muli %c4_i32, %c8_i32_31 : i32
    %117 = tpu.assume_multiple %116, 8 : i32
    %118 = arith.index_cast %117 : i32 to index
    %c0_32 = arith.constant 0 : index
    %119 = vector.load %arg12[%118, %c0_32] : memref<64x128xf32, #tpu.memory_space<vmem>>, vector<8x128xf32>
    %cst_33 = arith.constant dense<0.000000e+00> : vector<8x128xf32>
    %120 = tpu.matmul %113, %18, %cst_33 {dimension_numbers = #tpu.dot_dimension_numbers<[1], [0], [0], [1], [0, 0, 1, 1], [], []>} : vector<8x32xf32>, vector<32x128xf32>, vector<8x128xf32> -> vector<8x128xf32>
    %121 = arith.addf %119, %120 : vector<8x128xf32>
    %122 = math.tanh %121 : vector<8x128xf32>
    %123 = vector.broadcast %12 : vector<1x128xf32> to vector<8x128xf32>
    %124 = arith.mulf %122, %123 : vector<8x128xf32>
    %125 = vector.broadcast %15 : vector<1x128xf32> to vector<8x128xf32>
    %126 = arith.addf %124, %125 : vector<8x128xf32>
    %127 = vector.extract_strided_slice %126 {offsets = [0, 0], sizes = [8, 32], strides = [1, 1]} : vector<8x128xf32> to vector<8x32xf32>
    %128 = vector.extract_strided_slice %126 {offsets = [0, 32], sizes = [8, 32], strides = [1, 1]} : vector<8x128xf32> to vector<8x32xf32>
    %129 = vector.extract_strided_slice %126 {offsets = [0, 64], sizes = [8, 32], strides = [1, 1]} : vector<8x128xf32> to vector<8x32xf32>
    %130 = vector.extract_strided_slice %126 {offsets = [0, 96], sizes = [8, 32], strides = [1, 1]} : vector<8x128xf32> to vector<8x32xf32>
    %131 = arith.mulf %128, %111 : vector<8x32xf32>
    %132 = arith.mulf %127, %129 : vector<8x32xf32>
    %133 = arith.addf %131, %132 : vector<8x32xf32>
    %134 = math.tanh %133 : vector<8x32xf32>
    %135 = arith.mulf %130, %134 : vector<8x32xf32>
    %136 = arith.index_cast %117 : i32 to index
    %c0_34 = arith.constant 0 : index
    %137 = vector.load %arg13[%136, %c0_34] : memref<64x32xf32, #tpu.memory_space<vmem>>, vector<8x32xf32>
    tpu.vector_store %arg13[%136, %c0_34], %135 {strides = array<i32>} : memref<64x32xf32, #tpu.memory_space<vmem>>, vector<8x32xf32>,
    %c5_i32 = arith.constant 5 : i32
    %c8_i32_35 = arith.constant 8 : i32
    %138 = arith.muli %c5_i32, %c8_i32_35 : i32
    %139 = tpu.assume_multiple %138, 8 : i32
    %140 = arith.index_cast %139 : i32 to index
    %c0_36 = arith.constant 0 : index
    %141 = vector.load %arg12[%140, %c0_36] : memref<64x128xf32, #tpu.memory_space<vmem>>, vector<8x128xf32>
    %cst_37 = arith.constant dense<0.000000e+00> : vector<8x128xf32>
    %142 = tpu.matmul %135, %18, %cst_37 {dimension_numbers = #tpu.dot_dimension_numbers<[1], [0], [0], [1], [0, 0, 1, 1], [], []>} : vector<8x32xf32>, vector<32x128xf32>, vector<8x128xf32> -> vector<8x128xf32>
    %143 = arith.addf %141, %142 : vector<8x128xf32>
    %144 = math.tanh %143 : vector<8x128xf32>
    %145 = vector.broadcast %12 : vector<1x128xf32> to vector<8x128xf32>
    %146 = arith.mulf %144, %145 : vector<8x128xf32>
    %147 = vector.broadcast %15 : vector<1x128xf32> to vector<8x128xf32>
    %148 = arith.addf %146, %147 : vector<8x128xf32>
    %149 = vector.extract_strided_slice %148 {offsets = [0, 0], sizes = [8, 32], strides = [1, 1]} : vector<8x128xf32> to vector<8x32xf32>
    %150 = vector.extract_strided_slice %148 {offsets = [0, 32], sizes = [8, 32], strides = [1, 1]} : vector<8x128xf32> to vector<8x32xf32>
    %151 = vector.extract_strided_slice %148 {offsets = [0, 64], sizes = [8, 32], strides = [1, 1]} : vector<8x128xf32> to vector<8x32xf32>
    %152 = vector.extract_strided_slice %148 {offsets = [0, 96], sizes = [8, 32], strides = [1, 1]} : vector<8x128xf32> to vector<8x32xf32>
    %153 = arith.mulf %150, %133 : vector<8x32xf32>
    %154 = arith.mulf %149, %151 : vector<8x32xf32>
    %155 = arith.addf %153, %154 : vector<8x32xf32>
    %156 = math.tanh %155 : vector<8x32xf32>
    %157 = arith.mulf %152, %156 : vector<8x32xf32>
    %158 = arith.index_cast %139 : i32 to index
    %c0_38 = arith.constant 0 : index
    %159 = vector.load %arg13[%158, %c0_38] : memref<64x32xf32, #tpu.memory_space<vmem>>, vector<8x32xf32>
    tpu.vector_store %arg13[%158, %c0_38], %157 {strides = array<i32>} : memref<64x32xf32, #tpu.memory_space<vmem>>, vector<8x32xf32>,
    %c6_i32 = arith.constant 6 : i32
    %c8_i32_39 = arith.constant 8 : i32
    %160 = arith.muli %c6_i32, %c8_i32_39 : i32
    %161 = tpu.assume_multiple %160, 8 : i32
    %162 = arith.index_cast %161 : i32 to index
    %c0_40 = arith.constant 0 : index
    %163 = vector.load %arg12[%162, %c0_40] : memref<64x128xf32, #tpu.memory_space<vmem>>, vector<8x128xf32>
    %cst_41 = arith.constant dense<0.000000e+00> : vector<8x128xf32>
    %164 = tpu.matmul %157, %18, %cst_41 {dimension_numbers = #tpu.dot_dimension_numbers<[1], [0], [0], [1], [0, 0, 1, 1], [], []>} : vector<8x32xf32>, vector<32x128xf32>, vector<8x128xf32> -> vector<8x128xf32>
    %165 = arith.addf %163, %164 : vector<8x128xf32>
    %166 = math.tanh %165 : vector<8x128xf32>
    %167 = vector.broadcast %12 : vector<1x128xf32> to vector<8x128xf32>
    %168 = arith.mulf %166, %167 : vector<8x128xf32>
    %169 = vector.broadcast %15 : vector<1x128xf32> to vector<8x128xf32>
    %170 = arith.addf %168, %169 : vector<8x128xf32>
    %171 = vector.extract_strided_slice %170 {offsets = [0, 0], sizes = [8, 32], strides = [1, 1]} : vector<8x128xf32> to vector<8x32xf32>
    %172 = vector.extract_strided_slice %170 {offsets = [0, 32], sizes = [8, 32], strides = [1, 1]} : vector<8x128xf32> to vector<8x32xf32>
    %173 = vector.extract_strided_slice %170 {offsets = [0, 64], sizes = [8, 32], strides = [1, 1]} : vector<8x128xf32> to vector<8x32xf32>
    %174 = vector.extract_strided_slice %170 {offsets = [0, 96], sizes = [8, 32], strides = [1, 1]} : vector<8x128xf32> to vector<8x32xf32>
    %175 = arith.mulf %172, %155 : vector<8x32xf32>
    %176 = arith.mulf %171, %173 : vector<8x32xf32>
    %177 = arith.addf %175, %176 : vector<8x32xf32>
    %178 = math.tanh %177 : vector<8x32xf32>
    %179 = arith.mulf %174, %178 : vector<8x32xf32>
    %180 = arith.index_cast %161 : i32 to index
    %c0_42 = arith.constant 0 : index
    %181 = vector.load %arg13[%180, %c0_42] : memref<64x32xf32, #tpu.memory_space<vmem>>, vector<8x32xf32>
    tpu.vector_store %arg13[%180, %c0_42], %179 {strides = array<i32>} : memref<64x32xf32, #tpu.memory_space<vmem>>, vector<8x32xf32>,
    %c7_i32 = arith.constant 7 : i32
    %c8_i32_43 = arith.constant 8 : i32
    %182 = arith.muli %c7_i32, %c8_i32_43 : i32
    %183 = tpu.assume_multiple %182, 8 : i32
    %184 = arith.index_cast %183 : i32 to index
    %c0_44 = arith.constant 0 : index
    %185 = vector.load %arg12[%184, %c0_44] : memref<64x128xf32, #tpu.memory_space<vmem>>, vector<8x128xf32>
    %cst_45 = arith.constant dense<0.000000e+00> : vector<8x128xf32>
    %186 = tpu.matmul %179, %18, %cst_45 {dimension_numbers = #tpu.dot_dimension_numbers<[1], [0], [0], [1], [0, 0, 1, 1], [], []>} : vector<8x32xf32>, vector<32x128xf32>, vector<8x128xf32> -> vector<8x128xf32>
    %187 = arith.addf %185, %186 : vector<8x128xf32>
    %188 = math.tanh %187 : vector<8x128xf32>
    %189 = vector.broadcast %12 : vector<1x128xf32> to vector<8x128xf32>
    %190 = arith.mulf %188, %189 : vector<8x128xf32>
    %191 = vector.broadcast %15 : vector<1x128xf32> to vector<8x128xf32>
    %192 = arith.addf %190, %191 : vector<8x128xf32>
    %193 = vector.extract_strided_slice %192 {offsets = [0, 0], sizes = [8, 32], strides = [1, 1]} : vector<8x128xf32> to vector<8x32xf32>
    %194 = vector.extract_strided_slice %192 {offsets = [0, 32], sizes = [8, 32], strides = [1, 1]} : vector<8x128xf32> to vector<8x32xf32>
    %195 = vector.extract_strided_slice %192 {offsets = [0, 64], sizes = [8, 32], strides = [1, 1]} : vector<8x128xf32> to vector<8x32xf32>
    %196 = vector.extract_strided_slice %192 {offsets = [0, 96], sizes = [8, 32], strides = [1, 1]} : vector<8x128xf32> to vector<8x32xf32>
    %197 = arith.mulf %194, %177 : vector<8x32xf32>
    %198 = arith.mulf %193, %195 : vector<8x32xf32>
    %199 = arith.addf %197, %198 : vector<8x32xf32>
    %200 = math.tanh %199 : vector<8x32xf32>
    %201 = arith.mulf %196, %200 : vector<8x32xf32>
    %202 = arith.index_cast %183 : i32 to index
    %c0_46 = arith.constant 0 : index
    %203 = vector.load %arg13[%202, %c0_46] : memref<64x32xf32, #tpu.memory_space<vmem>>, vector<8x32xf32>
    tpu.vector_store %arg13[%202, %c0_46], %201 {strides = array<i32>} : memref<64x32xf32, #tpu.memory_space<vmem>>, vector<8x32xf32>,
    %c8_i32_47 = arith.constant 8 : i32
    %c0_48 = arith.constant 0 : index
    %c0_49 = arith.constant 0 : index
    %204 = vector.load %arg5[%c0_48, %c0_49] : memref<32x128xf32, #tpu.memory_space<vmem>>, vector<32x128xf32>
    %205 = vector.broadcast %9 : vector<1x128xf32> to vector<32x128xf32>
    %206 = arith.mulf %204, %205 : vector<32x128xf32>
    %c0_50 = arith.constant 0 : index
    %c0_51 = arith.constant 0 : index
    %207 = vector.load %arg13[%c0_50, %c0_51] : memref<64x32xf32, #tpu.memory_space<vmem>>, vector<64x32xf32>
    %c0_52 = arith.constant 0 : index
    %c0_53 = arith.constant 0 : index
    %208 = vector.load %arg4[%c0_52, %c0_53] : memref<32x128xf32, #tpu.memory_space<vmem>>, vector<32x128xf32>
    %cst_54 = arith.constant dense<0.000000e+00> : vector<64x128xf32>
    %209 = tpu.matmul %207, %208, %cst_54 {dimension_numbers = #tpu.dot_dimension_numbers<[1], [0], [0], [1], [0, 0, 1, 1], [], []>} : vector<64x32xf32>, vector<32x128xf32>, vector<64x128xf32> -> vector<64x128xf32>
    %c0_55 = arith.constant 0 : index
    %c0_56 = arith.constant 0 : index
    %210 = vector.load %arg6[%c0_55, %c0_56] : memref<1x128xf32, #tpu.memory_space<vmem>>, vector<1x128xf32>
    %211 = vector.broadcast %210 : vector<1x128xf32> to vector<64x128xf32>
    %212 = arith.addf %209, %211 : vector<64x128xf32>
    %213 = vector.broadcast %9 : vector<1x128xf32> to vector<64x128xf32>
    %214 = arith.mulf %212, %213 : vector<64x128xf32>
    %c0_57 = arith.constant 0 : index
    %c0_58 = arith.constant 0 : index
    %215 = vector.load %arg12[%c0_57, %c0_58] : memref<64x128xf32, #tpu.memory_space<vmem>>, vector<64x128xf32>
    tpu.vector_store %arg12[%c0_57, %c0_58], %214 {strides = array<i32>} : memref<64x128xf32, #tpu.memory_space<vmem>>, vector<64x128xf32>,
    %c0_i32_59 = arith.constant 0 : i32
    %c8_i32_60 = arith.constant 8 : i32
    %216 = arith.muli %c0_i32_59, %c8_i32_60 : i32
    %217 = tpu.assume_multiple %216, 8 : i32
    %218 = arith.index_cast %217 : i32 to index
    %c0_61 = arith.constant 0 : index
    %219 = vector.load %arg12[%218, %c0_61] : memref<64x128xf32, #tpu.memory_space<vmem>>, vector<8x128xf32>
    %cst_62 = arith.constant dense<0.000000e+00> : vector<8x128xf32>
    %220 = tpu.matmul %0, %206, %cst_62 {dimension_numbers = #tpu.dot_dimension_numbers<[1], [0], [0], [1], [0, 0, 1, 1], [], []>} : vector<8x32xf32>, vector<32x128xf32>, vector<8x128xf32> -> vector<8x128xf32>
    %221 = arith.addf %219, %220 : vector<8x128xf32>
    %222 = math.tanh %221 : vector<8x128xf32>
    %223 = vector.broadcast %12 : vector<1x128xf32> to vector<8x128xf32>
    %224 = arith.mulf %222, %223 : vector<8x128xf32>
    %225 = vector.broadcast %15 : vector<1x128xf32> to vector<8x128xf32>
    %226 = arith.addf %224, %225 : vector<8x128xf32>
    %227 = vector.extract_strided_slice %226 {offsets = [0, 0], sizes = [8, 32], strides = [1, 1]} : vector<8x128xf32> to vector<8x32xf32>
    %228 = vector.extract_strided_slice %226 {offsets = [0, 32], sizes = [8, 32], strides = [1, 1]} : vector<8x128xf32> to vector<8x32xf32>
    %229 = vector.extract_strided_slice %226 {offsets = [0, 64], sizes = [8, 32], strides = [1, 1]} : vector<8x128xf32> to vector<8x32xf32>
    %230 = vector.extract_strided_slice %226 {offsets = [0, 96], sizes = [8, 32], strides = [1, 1]} : vector<8x128xf32> to vector<8x32xf32>
    %231 = arith.mulf %228, %0 : vector<8x32xf32>
    %232 = arith.mulf %227, %229 : vector<8x32xf32>
    %233 = arith.addf %231, %232 : vector<8x32xf32>
    %234 = math.tanh %233 : vector<8x32xf32>
    %235 = arith.mulf %230, %234 : vector<8x32xf32>
    %c1_i32_63 = arith.constant 1 : i32
    %c8_i32_64 = arith.constant 8 : i32
    %236 = arith.muli %c1_i32_63, %c8_i32_64 : i32
    %237 = tpu.assume_multiple %236, 8 : i32
    %238 = arith.index_cast %237 : i32 to index
    %c0_65 = arith.constant 0 : index
    %239 = vector.load %arg12[%238, %c0_65] : memref<64x128xf32, #tpu.memory_space<vmem>>, vector<8x128xf32>
    %cst_66 = arith.constant dense<0.000000e+00> : vector<8x128xf32>
    %240 = tpu.matmul %235, %206, %cst_66 {dimension_numbers = #tpu.dot_dimension_numbers<[1], [0], [0], [1], [0, 0, 1, 1], [], []>} : vector<8x32xf32>, vector<32x128xf32>, vector<8x128xf32> -> vector<8x128xf32>
    %241 = arith.addf %239, %240 : vector<8x128xf32>
    %242 = math.tanh %241 : vector<8x128xf32>
    %243 = vector.broadcast %12 : vector<1x128xf32> to vector<8x128xf32>
    %244 = arith.mulf %242, %243 : vector<8x128xf32>
    %245 = vector.broadcast %15 : vector<1x128xf32> to vector<8x128xf32>
    %246 = arith.addf %244, %245 : vector<8x128xf32>
    %247 = vector.extract_strided_slice %246 {offsets = [0, 0], sizes = [8, 32], strides = [1, 1]} : vector<8x128xf32> to vector<8x32xf32>
    %248 = vector.extract_strided_slice %246 {offsets = [0, 32], sizes = [8, 32], strides = [1, 1]} : vector<8x128xf32> to vector<8x32xf32>
    %249 = vector.extract_strided_slice %246 {offsets = [0, 64], sizes = [8, 32], strides = [1, 1]} : vector<8x128xf32> to vector<8x32xf32>
    %250 = vector.extract_strided_slice %246 {offsets = [0, 96], sizes = [8, 32], strides = [1, 1]} : vector<8x128xf32> to vector<8x32xf32>
    %251 = arith.mulf %248, %233 : vector<8x32xf32>
    %252 = arith.mulf %247, %249 : vector<8x32xf32>
    %253 = arith.addf %251, %252 : vector<8x32xf32>
    %254 = math.tanh %253 : vector<8x32xf32>
    %255 = arith.mulf %250, %254 : vector<8x32xf32>
    %c2_i32_67 = arith.constant 2 : i32
    %c8_i32_68 = arith.constant 8 : i32
    %256 = arith.muli %c2_i32_67, %c8_i32_68 : i32
    %257 = tpu.assume_multiple %256, 8 : i32
    %258 = arith.index_cast %257 : i32 to index
    %c0_69 = arith.constant 0 : index
    %259 = vector.load %arg12[%258, %c0_69] : memref<64x128xf32, #tpu.memory_space<vmem>>, vector<8x128xf32>
    %cst_70 = arith.constant dense<0.000000e+00> : vector<8x128xf32>
    %260 = tpu.matmul %255, %206, %cst_70 {dimension_numbers = #tpu.dot_dimension_numbers<[1], [0], [0], [1], [0, 0, 1, 1], [], []>} : vector<8x32xf32>, vector<32x128xf32>, vector<8x128xf32> -> vector<8x128xf32>
    %261 = arith.addf %259, %260 : vector<8x128xf32>
    %262 = math.tanh %261 : vector<8x128xf32>
    %263 = vector.broadcast %12 : vector<1x128xf32> to vector<8x128xf32>
    %264 = arith.mulf %262, %263 : vector<8x128xf32>
    %265 = vector.broadcast %15 : vector<1x128xf32> to vector<8x128xf32>
    %266 = arith.addf %264, %265 : vector<8x128xf32>
    %267 = vector.extract_strided_slice %266 {offsets = [0, 0], sizes = [8, 32], strides = [1, 1]} : vector<8x128xf32> to vector<8x32xf32>
    %268 = vector.extract_strided_slice %266 {offsets = [0, 32], sizes = [8, 32], strides = [1, 1]} : vector<8x128xf32> to vector<8x32xf32>
    %269 = vector.extract_strided_slice %266 {offsets = [0, 64], sizes = [8, 32], strides = [1, 1]} : vector<8x128xf32> to vector<8x32xf32>
    %270 = vector.extract_strided_slice %266 {offsets = [0, 96], sizes = [8, 32], strides = [1, 1]} : vector<8x128xf32> to vector<8x32xf32>
    %271 = arith.mulf %268, %253 : vector<8x32xf32>
    %272 = arith.mulf %267, %269 : vector<8x32xf32>
    %273 = arith.addf %271, %272 : vector<8x32xf32>
    %274 = math.tanh %273 : vector<8x32xf32>
    %275 = arith.mulf %270, %274 : vector<8x32xf32>
    %c3_i32_71 = arith.constant 3 : i32
    %c8_i32_72 = arith.constant 8 : i32
    %276 = arith.muli %c3_i32_71, %c8_i32_72 : i32
    %277 = tpu.assume_multiple %276, 8 : i32
    %278 = arith.index_cast %277 : i32 to index
    %c0_73 = arith.constant 0 : index
    %279 = vector.load %arg12[%278, %c0_73] : memref<64x128xf32, #tpu.memory_space<vmem>>, vector<8x128xf32>
    %cst_74 = arith.constant dense<0.000000e+00> : vector<8x128xf32>
    %280 = tpu.matmul %275, %206, %cst_74 {dimension_numbers = #tpu.dot_dimension_numbers<[1], [0], [0], [1], [0, 0, 1, 1], [], []>} : vector<8x32xf32>, vector<32x128xf32>, vector<8x128xf32> -> vector<8x128xf32>
    %281 = arith.addf %279, %280 : vector<8x128xf32>
    %282 = math.tanh %281 : vector<8x128xf32>
    %283 = vector.broadcast %12 : vector<1x128xf32> to vector<8x128xf32>
    %284 = arith.mulf %282, %283 : vector<8x128xf32>
    %285 = vector.broadcast %15 : vector<1x128xf32> to vector<8x128xf32>
    %286 = arith.addf %284, %285 : vector<8x128xf32>
    %287 = vector.extract_strided_slice %286 {offsets = [0, 0], sizes = [8, 32], strides = [1, 1]} : vector<8x128xf32> to vector<8x32xf32>
    %288 = vector.extract_strided_slice %286 {offsets = [0, 32], sizes = [8, 32], strides = [1, 1]} : vector<8x128xf32> to vector<8x32xf32>
    %289 = vector.extract_strided_slice %286 {offsets = [0, 64], sizes = [8, 32], strides = [1, 1]} : vector<8x128xf32> to vector<8x32xf32>
    %290 = vector.extract_strided_slice %286 {offsets = [0, 96], sizes = [8, 32], strides = [1, 1]} : vector<8x128xf32> to vector<8x32xf32>
    %291 = arith.mulf %288, %273 : vector<8x32xf32>
    %292 = arith.mulf %287, %289 : vector<8x32xf32>
    %293 = arith.addf %291, %292 : vector<8x32xf32>
    %294 = math.tanh %293 : vector<8x32xf32>
    %295 = arith.mulf %290, %294 : vector<8x32xf32>
    %c4_i32_75 = arith.constant 4 : i32
    %c8_i32_76 = arith.constant 8 : i32
    %296 = arith.muli %c4_i32_75, %c8_i32_76 : i32
    %297 = tpu.assume_multiple %296, 8 : i32
    %298 = arith.index_cast %297 : i32 to index
    %c0_77 = arith.constant 0 : index
    %299 = vector.load %arg12[%298, %c0_77] : memref<64x128xf32, #tpu.memory_space<vmem>>, vector<8x128xf32>
    %cst_78 = arith.constant dense<0.000000e+00> : vector<8x128xf32>
    %300 = tpu.matmul %295, %206, %cst_78 {dimension_numbers = #tpu.dot_dimension_numbers<[1], [0], [0], [1], [0, 0, 1, 1], [], []>} : vector<8x32xf32>, vector<32x128xf32>, vector<8x128xf32> -> vector<8x128xf32>
    %301 = arith.addf %299, %300 : vector<8x128xf32>
    %302 = math.tanh %301 : vector<8x128xf32>
    %303 = vector.broadcast %12 : vector<1x128xf32> to vector<8x128xf32>
    %304 = arith.mulf %302, %303 : vector<8x128xf32>
    %305 = vector.broadcast %15 : vector<1x128xf32> to vector<8x128xf32>
    %306 = arith.addf %304, %305 : vector<8x128xf32>
    %307 = vector.extract_strided_slice %306 {offsets = [0, 0], sizes = [8, 32], strides = [1, 1]} : vector<8x128xf32> to vector<8x32xf32>
    %308 = vector.extract_strided_slice %306 {offsets = [0, 32], sizes = [8, 32], strides = [1, 1]} : vector<8x128xf32> to vector<8x32xf32>
    %309 = vector.extract_strided_slice %306 {offsets = [0, 64], sizes = [8, 32], strides = [1, 1]} : vector<8x128xf32> to vector<8x32xf32>
    %310 = vector.extract_strided_slice %306 {offsets = [0, 96], sizes = [8, 32], strides = [1, 1]} : vector<8x128xf32> to vector<8x32xf32>
    %311 = arith.mulf %308, %293 : vector<8x32xf32>
    %312 = arith.mulf %307, %309 : vector<8x32xf32>
    %313 = arith.addf %311, %312 : vector<8x32xf32>
    %314 = math.tanh %313 : vector<8x32xf32>
    %315 = arith.mulf %310, %314 : vector<8x32xf32>
    %c5_i32_79 = arith.constant 5 : i32
    %c8_i32_80 = arith.constant 8 : i32
    %316 = arith.muli %c5_i32_79, %c8_i32_80 : i32
    %317 = tpu.assume_multiple %316, 8 : i32
    %318 = arith.index_cast %317 : i32 to index
    %c0_81 = arith.constant 0 : index
    %319 = vector.load %arg12[%318, %c0_81] : memref<64x128xf32, #tpu.memory_space<vmem>>, vector<8x128xf32>
    %cst_82 = arith.constant dense<0.000000e+00> : vector<8x128xf32>
    %320 = tpu.matmul %315, %206, %cst_82 {dimension_numbers = #tpu.dot_dimension_numbers<[1], [0], [0], [1], [0, 0, 1, 1], [], []>} : vector<8x32xf32>, vector<32x128xf32>, vector<8x128xf32> -> vector<8x128xf32>
    %321 = arith.addf %319, %320 : vector<8x128xf32>
    %322 = math.tanh %321 : vector<8x128xf32>
    %323 = vector.broadcast %12 : vector<1x128xf32> to vector<8x128xf32>
    %324 = arith.mulf %322, %323 : vector<8x128xf32>
    %325 = vector.broadcast %15 : vector<1x128xf32> to vector<8x128xf32>
    %326 = arith.addf %324, %325 : vector<8x128xf32>
    %327 = vector.extract_strided_slice %326 {offsets = [0, 0], sizes = [8, 32], strides = [1, 1]} : vector<8x128xf32> to vector<8x32xf32>
    %328 = vector.extract_strided_slice %326 {offsets = [0, 32], sizes = [8, 32], strides = [1, 1]} : vector<8x128xf32> to vector<8x32xf32>
    %329 = vector.extract_strided_slice %326 {offsets = [0, 64], sizes = [8, 32], strides = [1, 1]} : vector<8x128xf32> to vector<8x32xf32>
    %330 = vector.extract_strided_slice %326 {offsets = [0, 96], sizes = [8, 32], strides = [1, 1]} : vector<8x128xf32> to vector<8x32xf32>
    %331 = arith.mulf %328, %313 : vector<8x32xf32>
    %332 = arith.mulf %327, %329 : vector<8x32xf32>
    %333 = arith.addf %331, %332 : vector<8x32xf32>
    %334 = math.tanh %333 : vector<8x32xf32>
    %335 = arith.mulf %330, %334 : vector<8x32xf32>
    %c6_i32_83 = arith.constant 6 : i32
    %c8_i32_84 = arith.constant 8 : i32
    %336 = arith.muli %c6_i32_83, %c8_i32_84 : i32
    %337 = tpu.assume_multiple %336, 8 : i32
    %338 = arith.index_cast %337 : i32 to index
    %c0_85 = arith.constant 0 : index
    %339 = vector.load %arg12[%338, %c0_85] : memref<64x128xf32, #tpu.memory_space<vmem>>, vector<8x128xf32>
    %cst_86 = arith.constant dense<0.000000e+00> : vector<8x128xf32>
    %340 = tpu.matmul %335, %206, %cst_86 {dimension_numbers = #tpu.dot_dimension_numbers<[1], [0], [0], [1], [0, 0, 1, 1], [], []>} : vector<8x32xf32>, vector<32x128xf32>, vector<8x128xf32> -> vector<8x128xf32>
    %341 = arith.addf %339, %340 : vector<8x128xf32>
    %342 = math.tanh %341 : vector<8x128xf32>
    %343 = vector.broadcast %12 : vector<1x128xf32> to vector<8x128xf32>
    %344 = arith.mulf %342, %343 : vector<8x128xf32>
    %345 = vector.broadcast %15 : vector<1x128xf32> to vector<8x128xf32>
    %346 = arith.addf %344, %345 : vector<8x128xf32>
    %347 = vector.extract_strided_slice %346 {offsets = [0, 0], sizes = [8, 32], strides = [1, 1]} : vector<8x128xf32> to vector<8x32xf32>
    %348 = vector.extract_strided_slice %346 {offsets = [0, 32], sizes = [8, 32], strides = [1, 1]} : vector<8x128xf32> to vector<8x32xf32>
    %349 = vector.extract_strided_slice %346 {offsets = [0, 64], sizes = [8, 32], strides = [1, 1]} : vector<8x128xf32> to vector<8x32xf32>
    %350 = vector.extract_strided_slice %346 {offsets = [0, 96], sizes = [8, 32], strides = [1, 1]} : vector<8x128xf32> to vector<8x32xf32>
    %351 = arith.mulf %348, %333 : vector<8x32xf32>
    %352 = arith.mulf %347, %349 : vector<8x32xf32>
    %353 = arith.addf %351, %352 : vector<8x32xf32>
    %354 = math.tanh %353 : vector<8x32xf32>
    %355 = arith.mulf %350, %354 : vector<8x32xf32>
    %c7_i32_87 = arith.constant 7 : i32
    %c8_i32_88 = arith.constant 8 : i32
    %356 = arith.muli %c7_i32_87, %c8_i32_88 : i32
    %357 = tpu.assume_multiple %356, 8 : i32
    %358 = arith.index_cast %357 : i32 to index
    %c0_89 = arith.constant 0 : index
    %359 = vector.load %arg12[%358, %c0_89] : memref<64x128xf32, #tpu.memory_space<vmem>>, vector<8x128xf32>
    %cst_90 = arith.constant dense<0.000000e+00> : vector<8x128xf32>
    %360 = tpu.matmul %355, %206, %cst_90 {dimension_numbers = #tpu.dot_dimension_numbers<[1], [0], [0], [1], [0, 0, 1, 1], [], []>} : vector<8x32xf32>, vector<32x128xf32>, vector<8x128xf32> -> vector<8x128xf32>
    %361 = arith.addf %359, %360 : vector<8x128xf32>
    %362 = math.tanh %361 : vector<8x128xf32>
    %363 = vector.broadcast %12 : vector<1x128xf32> to vector<8x128xf32>
    %364 = arith.mulf %362, %363 : vector<8x128xf32>
    %365 = vector.broadcast %15 : vector<1x128xf32> to vector<8x128xf32>
    %366 = arith.addf %364, %365 : vector<8x128xf32>
    %367 = vector.extract_strided_slice %366 {offsets = [0, 0], sizes = [8, 32], strides = [1, 1]} : vector<8x128xf32> to vector<8x32xf32>
    %368 = vector.extract_strided_slice %366 {offsets = [0, 32], sizes = [8, 32], strides = [1, 1]} : vector<8x128xf32> to vector<8x32xf32>
    %369 = vector.extract_strided_slice %366 {offsets = [0, 64], sizes = [8, 32], strides = [1, 1]} : vector<8x128xf32> to vector<8x32xf32>
    %370 = vector.extract_strided_slice %366 {offsets = [0, 96], sizes = [8, 32], strides = [1, 1]} : vector<8x128xf32> to vector<8x32xf32>
    %371 = arith.mulf %368, %353 : vector<8x32xf32>
    %372 = arith.mulf %367, %369 : vector<8x32xf32>
    %373 = arith.addf %371, %372 : vector<8x32xf32>
    %374 = math.tanh %373 : vector<8x32xf32>
    %375 = arith.mulf %370, %374 : vector<8x32xf32>
    %c8_i32_91 = arith.constant 8 : i32
    %c0_92 = arith.constant 0 : index
    %c0_93 = arith.constant 0 : index
    %376 = vector.load %arg7[%c0_92, %c0_93] : memref<32x32xf32, #tpu.memory_space<vmem>>, vector<32x32xf32>
    %cst_94 = arith.constant dense<0.000000e+00> : vector<8x32xf32>
    %377 = tpu.matmul %375, %376, %cst_94 {dimension_numbers = #tpu.dot_dimension_numbers<[1], [0], [0], [1], [0, 0, 1, 1], [], []>} : vector<8x32xf32>, vector<32x32xf32>, vector<8x32xf32> -> vector<8x32xf32>
    %c0_95 = arith.constant 0 : index
    %c0_96 = arith.constant 0 : index
    %378 = vector.load %arg8[%c0_95, %c0_96] : memref<1x32xf32, #tpu.memory_space<vmem>>, vector<1x32xf32>
    %379 = vector.broadcast %378 : vector<1x32xf32> to vector<8x32xf32>
    %380 = arith.addf %377, %379 : vector<8x32xf32>
    %cst_97 = arith.constant 0.000000e+00 : f32
    %381 = vector.broadcast %cst_97 : f32 to vector<8x32xf32>
    %382 = arith.maximumf %380, %381 : vector<8x32xf32>
    %c0_98 = arith.constant 0 : index
    %c0_99 = arith.constant 0 : index
    %383 = vector.load %arg9[%c0_98, %c0_99] : memref<32x6xf32, #tpu.memory_space<vmem>>, vector<32x6xf32>
    %cst_100 = arith.constant dense<0.000000e+00> : vector<8x6xf32>
    %384 = tpu.matmul %382, %383, %cst_100 {dimension_numbers = #tpu.dot_dimension_numbers<[1], [0], [0], [1], [0, 0, 1, 1], [], []>} : vector<8x32xf32>, vector<32x6xf32>, vector<8x6xf32> -> vector<8x6xf32>
    %c0_101 = arith.constant 0 : index
    %c0_102 = arith.constant 0 : index
    %385 = vector.load %arg10[%c0_101, %c0_102] : memref<1x6xf32, #tpu.memory_space<vmem>>, vector<1x6xf32>
    %386 = vector.broadcast %385 : vector<1x6xf32> to vector<8x6xf32>
    %387 = arith.addf %384, %386 : vector<8x6xf32>
    %c0_103 = arith.constant 0 : index
    %c0_104 = arith.constant 0 : index
    %388 = vector.load %arg11[%c0_103, %c0_104] : memref<8x6xf32, #tpu.memory_space<vmem>>, vector<8x6xf32>
    tpu.vector_store %arg11[%c0_103, %c0_104], %387 {strides = array<i32>} : memref<8x6xf32, #tpu.memory_space<vmem>>, vector<8x6xf32>,
    return
  }
}

</mosaic_0001>

<bundles_post_ra>
// kernel: tpu_custom_call.1
= control target key start
LH: loop header
LB: loop body
LE: loop exit
PB: predicated region body
PF: predicated region fallthrough
CT: control target
= control target key end

     0   :  { %16 = vsyncpa [#allocation5], 0  ;;  %s1743_s0 = inlined_call_operand.vmem [shape: f32[64,4], index: 0, kind: input, shape index: {}]   ;;  %s1744_s1 = inlined_call_operand.vmem [shape: f32[4,128], index: 1, kind: input, shape index: {}]   ;;  %s1745_s2 = inlined_call_operand.vmem [shape: f32[32,128], index: 2, kind: input, shape index: {}]   ;;  %s1746_s3 = inlined_call_operand.vmem [shape: f32[1,128], index: 3, kind: input, shape index: {}]   ;;  %s1747_s4 = inlined_call_operand.vmem [shape: f32[32,128], index: 4, kind: input, shape index: {}]   ;;  %s1748_s5 = inlined_call_operand.vmem [shape: f32[32,128], index: 5, kind: input, shape index: {}]   ;;  %s1749_s6 = inlined_call_operand.vmem [shape: f32[1,128], index: 6, kind: input, shape index: {}]   ;;  %s1750_s7 = inlined_call_operand.hbm [shape: f32[32,32], index: 7, kind: input, shape index: {}]   ;;  %s1751_s8 = inlined_call_operand.vmem [shape: f32[1,32], index: 8, kind: input, shape index: {}]   ;;  %s1752_s9 = inlined_call_operand.vmem [shape: f32[32,6], index: 9, kind: input, shape index: {}]   ;;  %s1753_s10 = inlined_call_operand.vmem [shape: f32[1,6], index: 10, kind: input, shape index: {}]   ;;  %s1754_s11 = inlined_call_operand.hbm [shape: f32[8,6], index: 11, kind: output, shape index: {}]  }
   0x1   :  { %17 = vsyncpa [#allocation6], 0  ;;  %s36_s19 = sshll.u32 %s1750_s7, 4  ;;  %s1298_s20 = smov [#allocation4]   ;;  %s37_s19 = int_to_ptr.hbm [resolvable:$true] %s36_s19 }
   0x2   :  { %s38_s21 = sshll.u32 %s1298_s20, 4  ;;  %s1299_s22 = smov 128   ;;  %s39_s21 = int_to_ptr.vmem [resolvable:$true] %s38_s21 }
   0x3   :  { %s1300_s23 = smov 8  }
   0x4   :  { %44 = dma.hbm_to_vmem [thread:$0]  %s37_s19, 512, %s39_s21, [#allocation5], %s1299_s22, %s1299_s22, %s1300_s23  }
   0x5   :  { %1294 = dma.done.wait [#allocation5], 512  }
   0x6   :  { %1295 = vsyncadd [#allocation5], 4294966784  ;;  %v55_v0 = vlaneseq  ;;  %vm108_vm3 = vcmask 1043456   ;;  %v1301_v3 = vmov 0.5   ;;  %vm83_vm4 = vcmask 31744   ;;  %v65_v5 = vld [vmem:[%s1745_s2 + $0x18] sm:$0xff] }
   0x7   :  { %v78_v6 = vld [vmem:[%s1744_s1] sm:$0xf]  ;;  %v64_v7 = vld [vmem:[%s1745_s2 + $0x10] sm:$0xff]  ;;  %v63_v11 = vld [vmem:[%s1745_s2 + $0x8] sm:$0xff]  ;;  %v1302_v15 = vmov 0.0   ;;  %s1303_s16 = smov 64  }
   0x8   :  { %v56_v1 = vand.u32 127, %v55_v0  ;;  %1137 = vmatpush.msk.msra.mxu0 %vm108_vm3, %v78_v6  ;;  %v70_v10 = vld [vmem:[%s1743_s0] sm:$0xff]  ;;  %v71_v34 = vld [vmem:[%s1743_s0 + $0x8] sm:$0xff]  ;;  %vm170_vm5 = vcmask 261120   ;;  %v72_v50 = vld [vmem:[%s1743_s0 + $0x10] sm:$0xff]  ;;  %s1305_s13 = smov [#allocation7]  }
   0x9   :  { %1138 = vmatmul.msk.f32.vlgmr.msra.gmra.mxu0 %vm83_vm4, %v70_v10  ;;  %v62_v12 = vld [vmem:[%s1745_s2] sm:$0xff]  ;;  %v73_v51 = vld [vmem:[%s1743_s0 + $0x18] sm:$0xff]  ;;  %v75_v53 = vld [vmem:[%s1743_s0 + $0x28] sm:$0xff]  ;;  %s1125_s1 = sshll.u32 %s1305_s13, 4  ;;  %vm1118_vm6 = vcmask 48128   ;;  %s1126_s1 = int_to_ptr.vmem [resolvable:$true] %s1125_s1 }
   0xa   :  { %vm57_vm0 = vcmp.ge.s32.totalorder %v56_v1, 64  ;;  %vm58_vm1 = vcmp.lt.s32.totalorder %v56_v1, 96  ;;  %v1431_v16 = vld [vmem:[%s1746_s3] ss:$0 sm:$0xff]  ;;  %s1304_s3 = smov 32   ;;  %v76_v56 = vld [vmem:[%s1743_s0 + $0x30] sm:$0xff] }
   0xb   :  { %vm1369_vm2 = vmand %vm57_vm0, %vm58_vm1  ;;  %v74_v52 = vld [vmem:[%s1743_s0 + $0x20] sm:$0xff]  ;;  %v77_v57 = vld [vmem:[%s1743_s0 + $0x38] sm:$0xff] }
   0xc   :  { %v1375_v4 = vsel %vm1369_vm2, 1.0, %v1301_v3  ;;  %v1437_v23 = vsel %vm1369_vm2, 0.0, %v1301_v3 }
   0xd   :  { %v1387_v8 = vmul.f32 %v65_v5, %v1375_v4  ;;  %v1390_v9 = vmul.f32 %v64_v7, %v1375_v4  ;;  %v1404_v13 = vmul.f32 %v63_v11, %v1375_v4  ;;  %v66_v14 = vmul.f32 %v62_v12, %v1375_v4 }
   0xf   :  { %186 = vmatpush.msra.mxu1 %v1387_v8  ;;  %236 = vmatpush.msra.mxu2 %v1387_v8 }
  0x10   :  { %287 = vmatpush.msrb.mxu0 %v1387_v8  ;;  %440 = vmatpush.msra.mxu3 %v1387_v8 }
  0x11   :  { %187 = vmatpush.msra.mxu1 %v1390_v9  ;;  %237 = vmatpush.msra.mxu2 %v1390_v9 }
  0x12   :  { %288 = vmatpush.msrb.mxu0 %v1390_v9  ;;  %441 = vmatpush.msra.mxu3 %v1390_v9 }
  0x13   :  { %188 = vmatpush.msra.mxu1 %v1404_v13  ;;  %238 = vmatpush.msra.mxu2 %v1404_v13 }
  0x14   :  { %289 = vmatpush.msrb.mxu0 %v1404_v13  ;;  %442 = vmatpush.msra.mxu3 %v1404_v13 }
  0x15   :  { %189 = vmatpush.msra.mxu1 %v66_v14  ;;  %239 = vmatpush.msra.mxu2 %v66_v14 }
  0x16   :  { %190 = vmatmul.f32.vlgmr.msra.gmra.mxu1 %v1302_v15  ;;  %290 = vmatpush.msrb.mxu0 %v66_v14 }
  0x17   :  { %338 = vmatpush.msrb.mxu1 %v1387_v8  ;;  %389 = vmatpush.msrb.mxu2 %v1387_v8 }
  0x18   :  { %443 = vmatpush.msra.mxu3 %v66_v14  ;;  %1139 = vmatmul.msk.f32.gmra.mxu0 %vm83_vm4, %v71_v34 }
  0x19   :  { %339 = vmatpush.msrb.mxu1 %v1390_v9  ;;  %390 = vmatpush.msrb.mxu2 %v1390_v9 }
  0x1b   :  { %340 = vmatpush.msrb.mxu1 %v1404_v13  ;;  %391 = vmatpush.msrb.mxu2 %v1404_v13 }
  0x1d   :  { %341 = vmatpush.msrb.mxu1 %v66_v14  ;;  %392 = vmatpush.msrb.mxu2 %v66_v14 }
  0x1f   :  { %491 = vmatpush.msra.mxu1 %v1387_v8 }
  0x20   :  { %1140 = vmatmul.msk.f32.gmra.mxu0 %vm83_vm4, %v72_v50 }
  0x21   :  { %492 = vmatpush.msra.mxu1 %v1390_v9 }
  0x23   :  { %493 = vmatpush.msra.mxu1 %v1404_v13 }
  0x25   :  { %494 = vmatpush.msra.mxu1 %v66_v14 }
  0x28   :  { %1141 = vmatmul.msk.f32.gmra.mxu0 %vm83_vm4, %v73_v51 }
  0x30   :  { %1142 = vmatmul.msk.f32.gmra.mxu0 %vm83_vm4, %v74_v52  ;;  %v596_v52 = vld [vmem:[%s1747_s4 + $0x18] sm:$0xff] }
  0x31   :  { %637 = vmatpush.msrb.mxu3 %v596_v52 }
  0x38   :  { %1143 = vmatmul.msk.f32.gmra.mxu0 %vm83_vm4, %v75_v53  ;;  %v595_v53 = vld [vmem:[%s1747_s4 + $0x10] sm:$0xff] }
  0x39   :  { %638 = vmatpush.msrb.mxu3 %v595_v53 }
  0x40   :  { %1144 = vmatmul.msk.f32.gmra.mxu0 %vm83_vm4, %v76_v56 }
  0x48   :  { %1145 = vmatmul.msk.f32.gmra.mxu0 %vm83_vm4, %v77_v57 }
  0x86   :  { %v129_v17 = vpop.f32.mrf.mxu0 }
  0x87   :  { %v130_v18 = vadd.f32 %v1431_v16, %v129_v17 }
  0x89   :  { %v153_v19 = vmul.f32 %v130_v18, %v1375_v4 }
  0x93   :  { %v191_v20 = vpop.f32.mrf.mxu1 }
  0x94   :  { %v194_v21 = vadd.f32 %v191_v20, %v153_v19 }
  0x95   :  { %v132_v36 = vpop.f32.mrf.mxu0 }
  0x96   :  { %1182 = vtanh.f32 %v194_v21  ;;  %v133_v37 = vadd.f32 %v1431_v16, %v132_v36 }
  0x98   :  { %v154_v38 = vmul.f32 %v133_v37, %v1375_v4 }
  0x9c   :  { %v1183_v22 = vpop.eup %1182 }
  0x9d   :  { %v196_v24 = vmul.f32 %v1183_v22, %v1375_v4  ;;  %v135_v59 = vpop.f32.mrf.mxu0 }
  0x9e   :  { %v136_v1 = vadd.f32 %v1431_v16, %v135_v59 }
  0x9f   :  { %v197_v25 = vadd.f32 %v196_v24, %v1437_v23 }
  0xa0   :  { %v155_v2 = vmul.f32 %v136_v1, %v1375_v4 }
  0xa1   :  { %200 = vrot.lane.b32.xlu0 %v197_v25, %s1303_s16  ;;  %v198_v28 = vmul.f32 0.0, %v197_v25 }
  0xa5   :  { %v138_v60 = vpop.f32.mrf.mxu0 }
  0xa6   :  { %v139_v20 = vadd.f32 %v1431_v16, %v138_v60 }
  0xa8   :  { %v156_v21 = vmul.f32 %v139_v20, %v1375_v4  ;;  %v579_v20 = vld [vmem:[%s1748_s5 + $0x10] sm:$0xff] }
  0xad   :  { %v141_v61 = vpop.f32.mrf.mxu0 }
  0xae   :  { %v142_v37 = vadd.f32 %v1431_v16, %v141_v61 }
  0xb5   :  { %v1488_v62 = vpop.f32.mrf.mxu0 }
  0xb6   :  { %v145_v1 = vadd.f32 %v1431_v16, %v1488_v62 }
  0xbd   :  { %v1490_v63 = vpop.f32.mrf.mxu0 }
  0xc5   :  { %v1492_v0 = vpop.f32.mrf.mxu0 }
 0x113   :  { %v201_v26 = vpop.permute.xlu0 %200 }
 0x114   :  { %v203_v27 = vmul.f32 %v201_v26, %v197_v25 }
 0x116   :  { %205 = vrot.lane.b32.xlu0 %v203_v27, %s1304_s3 }
 0x188   :  { %v206_v29 = vpop.permute.xlu0 %205 }
 0x189   :  { %v208_v30 = vadd.f32 %v206_v29, %v198_v28 }
 0x18b   :  { %1184 = vtanh.f32 %v208_v30 }
 0x191   :  { %v1185_v31 = vpop.eup %1184 }
 0x192   :  { %211 = vrot.lane.b32.xlu1 %v1185_v31, %s1303_s16 }
 0x204   :  { %v212_v32 = vpop.permute.xlu1 %211 }
 0x205   :  { %v214_v33 = vmul.f32 %v212_v32, %v197_v25 }
 0x207   :  { %216 = vrot.lane.b32.xlu1 %v214_v33, %s1304_s3 }
 0x279   :  { %v217_v35 = vpop.permute.xlu1 %216 }
 0x27a   :  { %219 = vst.msk [vmem:[#allocation3] sm:$0xff] %vm170_vm5, %v217_v35  ;;  %1146 = vmatmul.msk.f32.vlgmr.msra.gmra.mxu2 %vm170_vm5, %v217_v35 }
 0x27b   :  { %542 = vmatpush.msra.mxu2 %v1387_v8 }
 0x27d   :  { %543 = vmatpush.msra.mxu2 %v1390_v9 }
 0x27f   :  { %544 = vmatpush.msra.mxu2 %v1404_v13 }
 0x281   :  { %545 = vmatpush.msra.mxu2 %v66_v14  ;;  %v585_v57 = vld [vmem:[#allocation3] sm:$0xff] }
 0x2fd   :  { %v241_v39 = vpop.f32.mrf.mxu2 }
 0x2fe   :  { %v244_v40 = vadd.f32 %v241_v39, %v154_v38  ;;  %v157_v38 = vmul.f32 %v142_v37, %v1375_v4 }
 0x300   :  { %1186 = vtanh.f32 %v244_v40 }
 0x306   :  { %v1187_v41 = vpop.eup %1186 }
 0x307   :  { %v246_v42 = vmul.f32 %v1187_v41, %v1375_v4 }
 0x309   :  { %v247_v43 = vadd.f32 %v246_v42, %v1437_v23 }
 0x30b   :  { %250 = vrot.lane.b32.xlu2 %v247_v43, %s1303_s16  ;;  %v248_v46 = vmul.f32 %v247_v43, %v208_v30 }
 0x365   :  { %v251_v44 = vpop.permute.xlu2 %250 }
 0x366   :  { %v253_v45 = vmul.f32 %v251_v44, %v247_v43 }
 0x368   :  { %255 = vrot.lane.b32.xlu2 %v253_v45, %s1304_s3 }
 0x3c2   :  { %v256_v47 = vpop.permute.xlu2 %255 }
 0x3c3   :  { %v258_v48 = vadd.f32 %v256_v47, %v248_v46 }
 0x3c5   :  { %1188 = vtanh.f32 %v258_v48 }
 0x3cb   :  { %v1189_v49 = vpop.eup %1188 }
 0x3cc   :  { %261 = vrot.lane.b32.xlu0 %v1189_v49, %s1303_s16 }
 0x43e   :  { %v262_v54 = vpop.permute.xlu0 %261 }
 0x43f   :  { %v264_v55 = vmul.f32 %v262_v54, %v247_v43  ;;  %v594_v54 = vld [vmem:[%s1747_s4 + $0x8] sm:$0xff] }
 0x440   :  { %639 = vmatpush.msrb.mxu3 %v594_v54 }
 0x441   :  { %266 = vrot.lane.b32.xlu1 %v264_v55, %s1304_s3  ;;  %v593_v55 = vld [vmem:[%s1747_s4] sm:$0xff] }
 0x442   :  { %640 = vmatpush.msrb.mxu3 %v593_v55 }
 0x4b3   :  { %v267_v58 = vpop.permute.xlu1 %266 }
 0x4b4   :  { %270 = vst.msk [vmem:[#allocation3 + $0x8] sm:$0xff] %vm170_vm5, %v267_v58  ;;  %1147 = vmatmul.msk.f32.vlgmr.msrb.gmra.mxu0 %vm170_vm5, %v267_v58 }
 0x4bb   :  { %v586_v58 = vld [vmem:[#allocation3 + $0x8] sm:$0xff] }
 0x531   :  { %v292_v3 = vpop.f32.mrf.mxu0 }
 0x532   :  { %v295_v5 = vadd.f32 %v292_v3, %v155_v2  ;;  %v158_v2 = vmul.f32 %v145_v1, %v1375_v4 }
 0x534   :  { %1190 = vtanh.f32 %v295_v5 }
 0x53a   :  { %v1191_v6 = vpop.eup %1190 }
 0x53b   :  { %v297_v7 = vmul.f32 %v1191_v6, %v1375_v4 }
 0x53d   :  { %v298_v8 = vadd.f32 %v297_v7, %v1437_v23 }
 0x53f   :  { %301 = vrot.lane.b32.xlu2 %v298_v8, %s1303_s16  ;;  %v299_v11 = vmul.f32 %v298_v8, %v258_v48 }
 0x599   :  { %v302_v9 = vpop.permute.xlu2 %301 }
 0x59a   :  { %v304_v10 = vmul.f32 %v302_v9, %v298_v8 }
 0x59c   :  { %306 = vrot.lane.b32.xlu0 %v304_v10, %s1304_s3 }
 0x60e   :  { %v307_v12 = vpop.permute.xlu0 %306 }
 0x60f   :  { %v309_v13 = vadd.f32 %v307_v12, %v299_v11 }
 0x611   :  { %1192 = vtanh.f32 %v309_v13 }
 0x617   :  { %v1193_v14 = vpop.eup %1192 }
 0x618   :  { %312 = vrot.lane.b32.xlu1 %v1193_v14, %s1303_s16 }
 0x68a   :  { %v313_v17 = vpop.permute.xlu1 %312 }
 0x68b   :  { %v315_v18 = vmul.f32 %v313_v17, %v298_v8 }
 0x68d   :  { %317 = vrot.lane.b32.xlu2 %v315_v18, %s1304_s3  ;;  %v580_v18 = vld [vmem:[%s1748_s5 + $0x18] sm:$0xff] }
 0x6e7   :  { %v318_v19 = vpop.permute.xlu2 %317 }
 0x6e8   :  { %321 = vst.msk [vmem:[#allocation3 + $0x10] sm:$0xff] %vm170_vm5, %v318_v19  ;;  %1148 = vmatmul.msk.f32.vlgmr.msrb.gmra.mxu1 %vm170_vm5, %v318_v19  ;;  %v1557_v19 = vmul.f32 %v580_v18, %v1375_v4 }
 0x6ea   :  { %695 = vmatpush.msrb.mxu1 %v1557_v19 }
 0x6ef   :  { %v587_v59 = vld [vmem:[#allocation3 + $0x10] sm:$0xff] }
 0x765   :  { %v343_v22 = vpop.f32.mrf.mxu1 }
 0x766   :  { %v346_v24 = vadd.f32 %v343_v22, %v156_v21  ;;  %v578_v21 = vld [vmem:[%s1748_s5 + $0x8] sm:$0xff]  ;;  %v577_v22 = vld [vmem:[%s1748_s5] sm:$0xff] }
 0x768   :  { %1194 = vtanh.f32 %v346_v24  ;;  %v1570_v24 = vmul.f32 %v579_v20, %v1375_v4 }
 0x76a   :  { %696 = vmatpush.msrb.mxu1 %v1570_v24 }
 0x76e   :  { %v1195_v25 = vpop.eup %1194 }
 0x76f   :  { %v348_v26 = vmul.f32 %v1195_v25, %v1375_v4  ;;  %v1573_v25 = vmul.f32 %v578_v21, %v1375_v4 }
 0x771   :  { %v349_v27 = vadd.f32 %v348_v26, %v1437_v23  ;;  %v1578_v26 = vmul.f32 %v577_v22, %v1375_v4  ;;  %697 = vmatpush.msrb.mxu1 %v1573_v25 }
 0x773   :  { %352 = vrot.lane.b32.xlu0 %v349_v27, %s1303_s16  ;;  %v350_v30 = vmul.f32 %v349_v27, %v309_v13  ;;  %698 = vmatpush.msrb.mxu1 %v1578_v26 }
 0x7e5   :  { %v353_v28 = vpop.permute.xlu0 %352 }
 0x7e6   :  { %v355_v29 = vmul.f32 %v353_v28, %v349_v27 }
 0x7e8   :  { %357 = vrot.lane.b32.xlu1 %v355_v29, %s1304_s3  ;;  %v148_v29 = vadd.f32 %v1431_v16, %v1490_v63 }
 0x85a   :  { %v358_v31 = vpop.permute.xlu1 %357 }
 0x85b   :  { %v360_v32 = vadd.f32 %v358_v31, %v350_v30  ;;  %v1602_v30 = vld [vmem:[%s1749_s6] ss:$0 sm:$0xff]  ;;  %v159_v31 = vmul.f32 %v148_v29, %v1375_v4 }
 0x85d   :  { %1196 = vtanh.f32 %v360_v32 }
 0x863   :  { %v1197_v33 = vpop.eup %1196 }
 0x864   :  { %363 = vrot.lane.b32.xlu2 %v1197_v33, %s1303_s16 }
 0x8be   :  { %v364_v34 = vpop.permute.xlu2 %363 }
 0x8bf   :  { %v366_v35 = vmul.f32 %v364_v34, %v349_v27 }
 0x8c1   :  { %368 = vrot.lane.b32.xlu0 %v366_v35, %s1304_s3 }
 0x933   :  { %v369_v36 = vpop.permute.xlu0 %368 }
 0x934   :  { %372 = vst.msk [vmem:[#allocation3 + $0x18] sm:$0xff] %vm170_vm5, %v369_v36  ;;  %1149 = vmatmul.msk.f32.vlgmr.msrb.gmra.mxu2 %vm170_vm5, %v369_v36 }
 0x935   :  { %742 = vmatpush.msrb.mxu2 %v1557_v19 }
 0x937   :  { %743 = vmatpush.msrb.mxu2 %v1570_v24 }
 0x939   :  { %744 = vmatpush.msrb.mxu2 %v1573_v25 }
 0x93b   :  { %v588_v60 = vld [vmem:[#allocation3 + $0x18] sm:$0xff]  ;;  %745 = vmatpush.msrb.mxu2 %v1578_v26 }
 0x9b7   :  { %v394_v39 = vpop.f32.mrf.mxu2 }
 0x9b8   :  { %v397_v40 = vadd.f32 %v394_v39, %v157_v38 }
 0x9ba   :  { %1198 = vtanh.f32 %v397_v40 }
 0x9c0   :  { %v1199_v41 = vpop.eup %1198 }
 0x9c1   :  { %v399_v42 = vmul.f32 %v1199_v41, %v1375_v4 }
 0x9c3   :  { %v400_v43 = vadd.f32 %v399_v42, %v1437_v23 }
 0x9c5   :  { %403 = vrot.lane.b32.xlu1 %v400_v43, %s1303_s16  ;;  %v401_v46 = vmul.f32 %v400_v43, %v360_v32 }
 0xa37   :  { %v404_v44 = vpop.permute.xlu1 %403 }
 0xa38   :  { %v406_v45 = vmul.f32 %v404_v44, %v400_v43 }
 0xa3a   :  { %408 = vrot.lane.b32.xlu2 %v406_v45, %s1304_s3 }
 0xa94   :  { %v409_v47 = vpop.permute.xlu2 %408 }
 0xa95   :  { %v411_v48 = vadd.f32 %v409_v47, %v401_v46 }
 0xa97   :  { %1200 = vtanh.f32 %v411_v48 }
 0xa9d   :  { %v1201_v49 = vpop.eup %1200 }
 0xa9e   :  { %414 = vrot.lane.b32.xlu0 %v1201_v49, %s1303_s16 }
 0xb10   :  { %v415_v50 = vpop.permute.xlu0 %414 }
 0xb11   :  { %v417_v51 = vmul.f32 %v415_v50, %v400_v43 }
 0xb13   :  { %419 = vrot.lane.b32.xlu1 %v417_v51, %s1304_s3 }
 0xb85   :  { %v420_v56 = vpop.permute.xlu1 %419 }
 0xb86   :  { %423 = vst.msk [vmem:[#allocation3 + $0x20] sm:$0xff] %vm170_vm5, %v420_v56  ;;  %1150 = vmatmul.msk.f32.vlgmr.msra.gmra.mxu3 %vm170_vm5, %v420_v56 }
 0xb8d   :  { %v589_v61 = vld [vmem:[#allocation3 + $0x20] sm:$0xff] }
 0xb8e   :  { %1153 = vmatmul.msk.f32.vlgmr.msrb.gmra.mxu3 %vm170_vm5, %v585_v57 }
 0xb96   :  { %1154 = vmatmul.msk.f32.gmra.mxu3 %vm170_vm5, %v586_v58 }
 0xb9e   :  { %1155 = vmatmul.msk.f32.gmra.mxu3 %vm170_vm5, %v587_v59 }
 0xba6   :  { %1156 = vmatmul.msk.f32.gmra.mxu3 %vm170_vm5, %v588_v60 }
 0xbae   :  { %1157 = vmatmul.msk.f32.gmra.mxu3 %vm170_vm5, %v589_v61 }
 0xc09   :  { %v445_v3 = vpop.f32.mrf.mxu3 }
 0xc0a   :  { %v448_v5 = vadd.f32 %v445_v3, %v158_v2 }
 0xc0c   :  { %1202 = vtanh.f32 %v448_v5 }
 0xc11   :  { %v642_v32 = vpop.f32.mrf.mxu3 }
 0xc12   :  { %v1203_v6 = vpop.eup %1202  ;;  %v643_v34 = vadd.f32 %v1602_v30, %v642_v32 }
 0xc13   :  { %v450_v7 = vmul.f32 %v1203_v6, %v1375_v4 }
 0xc14   :  { %v666_v35 = vmul.f32 %v643_v34, %v1375_v4 }
 0xc15   :  { %v451_v8 = vadd.f32 %v450_v7, %v1437_v23 }
 0xc17   :  { %454 = vrot.lane.b32.xlu2 %v451_v8, %s1303_s16  ;;  %v452_v11 = vmul.f32 %v451_v8, %v411_v48 }
 0xc19   :  { %v645_v1 = vpop.f32.mrf.mxu3 }
 0xc1a   :  { %v646_v3 = vadd.f32 %v1602_v30, %v645_v1 }
 0xc1c   :  { %v667_v5 = vmul.f32 %v646_v3, %v1375_v4 }
 0xc21   :  { %v648_v22 = vpop.f32.mrf.mxu3 }
 0xc71   :  { %v455_v9 = vpop.permute.xlu2 %454 }
 0xc72   :  { %v457_v10 = vmul.f32 %v455_v9, %v451_v8 }
 0xc74   :  { %459 = vrot.lane.b32.xlu0 %v457_v10, %s1304_s3 }
 0xce6   :  { %v460_v12 = vpop.permute.xlu0 %459 }
 0xce7   :  { %v1548_v13 = vadd.f32 %v460_v12, %v452_v11 }
 0xce9   :  { %1204 = vtanh.f32 %v1548_v13 }
 0xcef   :  { %v1205_v62 = vpop.eup %1204 }
 0xcf0   :  { %465 = vrot.lane.b32.xlu1 %v1205_v62, %s1303_s16 }
 0xd62   :  { %v466_v14 = vpop.permute.xlu1 %465 }
 0xd63   :  { %v468_v17 = vmul.f32 %v466_v14, %v451_v8 }
 0xd65   :  { %470 = vrot.lane.b32.xlu2 %v468_v17, %s1304_s3 }
 0xdbf   :  { %v471_v27 = vpop.permute.xlu2 %470 }
 0xdc0   :  { %474 = vst.msk [vmem:[#allocation3 + $0x28] sm:$0xff] %vm170_vm5, %v471_v27  ;;  %1151 = vmatmul.msk.f32.vlgmr.msra.gmra.mxu1 %vm170_vm5, %v471_v27  ;;  %v649_v27 = vadd.f32 %v1602_v30, %v648_v22 }
 0xdc1   :  { %789 = vmatpush.msra.mxu1 %v1557_v19 }
 0xdc3   :  { %790 = vmatpush.msra.mxu1 %v1570_v24 }
 0xdc5   :  { %791 = vmatpush.msra.mxu1 %v1573_v25 }
 0xdc7   :  { %v590_v28 = vld [vmem:[#allocation3 + $0x28] sm:$0xff]  ;;  %792 = vmatpush.msra.mxu1 %v1578_v26 }
 0xdc8   :  { %1158 = vmatmul.msk.f32.gmra.mxu3 %vm170_vm5, %v590_v28  ;;  %699 = vmatmul.f32.vlgmr.msrb.gmra.mxu1 %v1302_v15  ;;  %v668_v28 = vmul.f32 %v649_v27, %v1375_v4 }
 0xdc9   :  { %883 = vmatpush.msrb.mxu1 %v1557_v19 }
 0xdcb   :  { %884 = vmatpush.msrb.mxu1 %v1570_v24 }
 0xdcd   :  { %885 = vmatpush.msrb.mxu1 %v1573_v25 }
 0xdcf   :  { %886 = vmatpush.msrb.mxu1 %v1578_v26 }
 0xe3d   :  { %v496_v15 = vpop.f32.mrf.mxu1 }
 0xe3e   :  { %v499_v33 = vadd.f32 %v496_v15, %v159_v31 }
 0xe40   :  { %1206 = vtanh.f32 %v499_v33 }
 0xe45   :  { %v700_v36 = vpop.f32.mrf.mxu1 }
 0xe46   :  { %v1207_v37 = vpop.eup %1206  ;;  %v703_v38 = vadd.f32 %v700_v36, %v666_v35 }
 0xe47   :  { %v501_v63 = vmul.f32 %v1207_v37, %v1375_v4 }
 0xe48   :  { %1208 = vtanh.f32 %v703_v38 }
 0xe49   :  { %v502_v39 = vadd.f32 %v501_v63, %v1437_v23 }
 0xe4b   :  { %505 = vrot.lane.b32.xlu0 %v502_v39, %s1303_s16  ;;  %v503_v47 = vmul.f32 %v502_v39, %v1548_v13 }
 0xe4e   :  { %v1209_v40 = vpop.eup %1208 }
 0xe4f   :  { %v705_v41 = vmul.f32 %v1209_v40, %v1375_v4 }
 0xe51   :  { %v706_v42 = vadd.f32 %v705_v41, %v1437_v23 }
 0xe53   :  { %709 = vrot.lane.b32.xlu1 %v706_v42, %s1303_s16  ;;  %v707_v51 = vmul.f32 0.0, %v706_v42 }
 0xebd   :  { %v506_v43 = vpop.permute.xlu0 %505 }
 0xebe   :  { %v508_v44 = vmul.f32 %v506_v43, %v502_v39 }
 0xec0   :  { %510 = vrot.lane.b32.xlu2 %v508_v44, %s1304_s3 }
 0xec5   :  { %v710_v45 = vpop.permute.xlu1 %709 }
 0xec6   :  { %v712_v46 = vmul.f32 %v710_v45, %v706_v42 }
 0xec8   :  { %714 = vrot.lane.b32.xlu0 %v712_v46, %s1304_s3 }
 0xf1a   :  { %v511_v48 = vpop.permute.xlu2 %510 }
 0xf1b   :  { %v1616_v49 = vadd.f32 %v511_v48, %v503_v47 }
 0xf1d   :  { %1210 = vtanh.f32 %v1616_v49 }
 0xf23   :  { %v1211_v50 = vpop.eup %1210 }
 0xf24   :  { %516 = vrot.lane.b32.xlu1 %v1211_v50, %s1303_s16 }
 0xf3a   :  { %v715_v52 = vpop.permute.xlu0 %714 }
 0xf3b   :  { %v717_v53 = vadd.f32 %v715_v52, %v707_v51 }
 0xf3d   :  { %1212 = vtanh.f32 %v717_v53 }
 0xf43   :  { %v1213_v54 = vpop.eup %1212 }
 0xf44   :  { %720 = vrot.lane.b32.xlu2 %v1213_v54, %s1303_s16 }
 0xf96   :  { %v517_v55 = vpop.permute.xlu1 %516 }
 0xf97   :  { %v519_v56 = vmul.f32 %v517_v55, %v502_v39 }
 0xf99   :  { %521 = vrot.lane.b32.xlu0 %v519_v56, %s1304_s3 }
 0xf9e   :  { %v721_v57 = vpop.permute.xlu2 %720 }
 0xf9f   :  { %v723_v58 = vmul.f32 %v721_v57, %v706_v42  ;;  %v651_v42 = vpop.f32.mrf.mxu3 }
 0xfa0   :  { %v652_v43 = vadd.f32 %v1602_v30, %v651_v42 }
 0xfa1   :  { %726 = vrot.lane.b32.xlu1 %v723_v58, %s1304_s3 }
 0xfa2   :  { %v669_v44 = vmul.f32 %v652_v43, %v1375_v4 }
 0xfa7   :  { %v654_v56 = vpop.f32.mrf.mxu3 }
 0xfa8   :  { %v655_v57 = vadd.f32 %v1602_v30, %v654_v56 }
 0xfaa   :  { %v670_v58 = vmul.f32 %v655_v57, %v1375_v4 }
0x100b   :  { %v522_v59 = vpop.permute.xlu0 %521 }
0x100c   :  { %525 = vst.msk [vmem:[#allocation3 + $0x30] sm:$0xff] %vm170_vm5, %v522_v59  ;;  %1152 = vmatmul.msk.f32.vlgmr.msra.gmra.mxu2 %vm170_vm5, %v522_v59 }
0x100d   :  { %836 = vmatpush.msra.mxu2 %v1557_v19 }
0x100f   :  { %837 = vmatpush.msra.mxu2 %v1570_v24 }
0x1011   :  { %838 = vmatpush.msra.mxu2 %v1573_v25 }
0x1013   :  { %v727_v60 = vpop.permute.xlu1 %726  ;;  %v591_v61 = vld [vmem:[#allocation3 + $0x30] sm:$0xff]  ;;  %839 = vmatpush.msra.mxu2 %v1578_v26 }
0x1014   :  { %1159 = vmatmul.msk.f32.gmra.mxu3 %vm170_vm5, %v591_v61  ;;  %1161 = vmatmul.msk.f32.vlgmr.msrb.gmra.mxu2 %vm170_vm5, %v727_v60 }
0x1015   :  { %930 = vmatpush.msrb.mxu2 %v1557_v19 }
0x1017   :  { %931 = vmatpush.msrb.mxu2 %v1570_v24 }
0x1019   :  { %932 = vmatpush.msrb.mxu2 %v1573_v25 }
0x101b   :  { %933 = vmatpush.msrb.mxu2 %v1578_v26 }
0x108f   :  { %v1635_v2 = vpop.f32.mrf.mxu2 }
0x1097   :  { %v747_v6 = vpop.f32.mrf.mxu2 }
0x1098   :  { %v750_v7 = vadd.f32 %v747_v6, %v667_v5 }
0x109a   :  { %1214 = vtanh.f32 %v750_v7 }
0x10a0   :  { %v1215_v8 = vpop.eup %1214 }
0x10a1   :  { %v752_v9 = vmul.f32 %v1215_v8, %v1375_v4 }
0x10a3   :  { %v753_v10 = vadd.f32 %v752_v9, %v1437_v23 }
0x10a5   :  { %756 = vrot.lane.b32.xlu2 %v753_v10, %s1303_s16  ;;  %v754_v13 = vmul.f32 %v753_v10, %v717_v53 }
0x10ff   :  { %v757_v11 = vpop.permute.xlu2 %756 }
0x1100   :  { %v759_v12 = vmul.f32 %v757_v11, %v753_v10 }
0x1102   :  { %761 = vrot.lane.b32.xlu0 %v759_v12, %s1304_s3 }
0x1174   :  { %v762_v62 = vpop.permute.xlu0 %761 }
0x1175   :  { %v764_v14 = vadd.f32 %v762_v62, %v754_v13  ;;  %v657_v62 = vpop.f32.mrf.mxu3 }
0x1177   :  { %1216 = vtanh.f32 %v764_v14 }
0x117d   :  { %v1217_v17 = vpop.eup %1216 }
0x117e   :  { %767 = vrot.lane.b32.xlu1 %v1217_v17, %s1303_s16 }
0x11f0   :  { %v768_v18 = vpop.permute.xlu1 %767 }
0x11f1   :  { %v770_v20 = vmul.f32 %v768_v18, %v753_v10 }
0x11f3   :  { %773 = vrot.lane.b32.xlu2 %v770_v20, %s1304_s3 }
0x124d   :  { %v774_v21 = vpop.permute.xlu2 %773 }
0x124e   :  { %1162 = vmatmul.msk.f32.vlgmr.msra.gmra.mxu1 %vm170_vm5, %v774_v21 }
0x124f   :  { %977 = vmatpush.msra.mxu1 %v1557_v19 }
0x1251   :  { %978 = vmatpush.msra.mxu1 %v1570_v24 }
0x1253   :  { %979 = vmatpush.msra.mxu1 %v1573_v25 }
0x1255   :  { %980 = vmatpush.msra.mxu1 %v1578_v26 }
0x12cb   :  { %v794_v29 = vpop.f32.mrf.mxu1 }
0x12cc   :  { %v797_v31 = vadd.f32 %v794_v29, %v668_v28  ;;  %v151_v28 = vadd.f32 %v1431_v16, %v1492_v0 }
0x12ce   :  { %1218 = vtanh.f32 %v797_v31  ;;  %v160_v29 = vmul.f32 %v151_v28, %v1375_v4 }
0x12d0   :  { %v550_v31 = vadd.f32 %v1635_v2, %v160_v29  ;;  %v1088_v29 = vld [vmem:[%s1752_s9 + $0x8] sm:$0xff] }
0x12d4   :  { %v1219_v32 = vpop.eup %1218 }
0x12d5   :  { %v799_v15 = vmul.f32 %v1219_v32, %v1375_v4 }
0x12d7   :  { %v800_v33 = vadd.f32 %v799_v15, %v1437_v23 }
0x12d9   :  { %803 = vrot.lane.b32.xlu0 %v800_v33, %s1303_s16  ;;  %v801_v36 = vmul.f32 %v800_v33, %v764_v14  ;;  %v658_v14 = vadd.f32 %v1602_v30, %v657_v62 }
0x12db   :  { %v671_v17 = vmul.f32 %v658_v14, %v1375_v4 }
0x134b   :  { %v804_v34 = vpop.permute.xlu0 %803 }
0x134c   :  { %v806_v35 = vmul.f32 %v804_v34, %v800_v33 }
0x134e   :  { %808 = vrot.lane.b32.xlu1 %v806_v35, %s1304_s3 }
0x13c0   :  { %v809_v37 = vpop.permute.xlu1 %808 }
0x13c1   :  { %v811_v38 = vadd.f32 %v809_v37, %v801_v36 }
0x13c3   :  { %1220 = vtanh.f32 %v811_v38 }
0x13c9   :  { %v1221_v63 = vpop.eup %1220 }
0x13ca   :  { %814 = vrot.lane.b32.xlu2 %v1221_v63, %s1303_s16 }
0x1424   :  { %v815_v39 = vpop.permute.xlu2 %814 }
0x1425   :  { %v817_v40 = vmul.f32 %v815_v39, %v800_v33 }
0x1427   :  { %820 = vrot.lane.b32.xlu0 %v817_v40, %s1304_s3 }
0x1499   :  { %v821_v41 = vpop.permute.xlu0 %820 }
0x149a   :  { %1163 = vmatmul.msk.f32.vlgmr.msra.gmra.mxu2 %vm170_vm5, %v821_v41  ;;  %v660_v41 = vpop.f32.mrf.mxu3 }
0x149b   :  { %1024 = vmatpush.msra.mxu2 %v1557_v19  ;;  %v661_v42 = vadd.f32 %v1602_v30, %v660_v41 }
0x149d   :  { %1025 = vmatpush.msra.mxu2 %v1570_v24  ;;  %v672_v43 = vmul.f32 %v661_v42, %v1375_v4 }
0x149f   :  { %1026 = vmatpush.msra.mxu2 %v1573_v25 }
0x14a1   :  { %1027 = vmatpush.msra.mxu2 %v1578_v26 }
0x151d   :  { %v841_v45 = vpop.f32.mrf.mxu2 }
0x151e   :  { %v844_v46 = vadd.f32 %v841_v45, %v669_v44 }
0x1520   :  { %1222 = vtanh.f32 %v844_v46 }
0x1526   :  { %v1223_v47 = vpop.eup %1222 }
0x1527   :  { %v846_v48 = vmul.f32 %v1223_v47, %v1375_v4 }
0x1529   :  { %v847_v50 = vadd.f32 %v846_v48, %v1437_v23 }
0x152b   :  { %850 = vrot.lane.b32.xlu1 %v847_v50, %s1303_s16  ;;  %v848_v25 = vmul.f32 %v847_v50, %v811_v38 }
0x159d   :  { %v851_v19 = vpop.permute.xlu1 %850 }
0x159e   :  { %v853_v24 = vmul.f32 %v851_v19, %v847_v50 }
0x15a0   :  { %855 = vrot.lane.b32.xlu2 %v853_v24, %s1304_s3 }
0x15fa   :  { %v856_v26 = vpop.permute.xlu2 %855 }
0x15fb   :  { %v858_v51 = vadd.f32 %v856_v26, %v848_v25 }
0x15fd   :  { %1224 = vtanh.f32 %v858_v51 }
0x1603   :  { %v1225_v52 = vpop.eup %1224 }
0x1604   :  { %861 = vrot.lane.b32.xlu0 %v1225_v52, %s1303_s16 }
0x1676   :  { %v862_v53 = vpop.permute.xlu0 %861 }
0x1677   :  { %v864_v54 = vmul.f32 %v862_v53, %v847_v50 }
0x1679   :  { %867 = vrot.lane.b32.xlu1 %v864_v54, %s1304_s3 }
0x16eb   :  { %v868_v55 = vpop.permute.xlu1 %867 }
0x16ec   :  { %1164 = vmatmul.msk.f32.vlgmr.msrb.gmra.mxu1 %vm170_vm5, %v868_v55 }
0x1769   :  { %v888_v59 = vpop.f32.mrf.mxu1 }
0x176a   :  { %v891_v60 = vadd.f32 %v888_v59, %v670_v58 }
0x176c   :  { %1226 = vtanh.f32 %v891_v60 }
0x1772   :  { %v1227_v61 = vpop.eup %1226 }
0x1773   :  { %v893_v1 = vmul.f32 %v1227_v61, %v1375_v4 }
0x1775   :  { %v894_v3 = vadd.f32 %v893_v1, %v1437_v23 }
0x1777   :  { %897 = vrot.lane.b32.xlu2 %v894_v3, %s1303_s16  ;;  %v895_v7 = vmul.f32 %v894_v3, %v858_v51 }
0x17d1   :  { %v898_v5 = vpop.permute.xlu2 %897 }
0x17d2   :  { %v900_v6 = vmul.f32 %v898_v5, %v894_v3 }
0x17d4   :  { %902 = vrot.lane.b32.xlu0 %v900_v6, %s1304_s3 }
0x1846   :  { %v903_v8 = vpop.permute.xlu0 %902 }
0x1847   :  { %v905_v9 = vadd.f32 %v903_v8, %v895_v7 }
0x1849   :  { %1228 = vtanh.f32 %v905_v9 }
0x184f   :  { %v1229_v10 = vpop.eup %1228 }
0x1850   :  { %908 = vrot.lane.b32.xlu1 %v1229_v10, %s1303_s16 }
0x18c2   :  { %v909_v11 = vpop.permute.xlu1 %908 }
0x18c3   :  { %v911_v12 = vmul.f32 %v909_v11, %v894_v3 }
0x18c5   :  { %914 = vrot.lane.b32.xlu2 %v911_v12, %s1304_s3 }
0x191f   :  { %v915_v13 = vpop.permute.xlu2 %914 }
0x1920   :  { %1165 = vmatmul.msk.f32.vlgmr.msrb.gmra.mxu2 %vm170_vm5, %v915_v13 }
0x19a3   :  { %v935_v18 = vpop.f32.mrf.mxu2 }
0x19a4   :  { %v938_v20 = vadd.f32 %v935_v18, %v671_v17  ;;  %v1056_v17 = vld [vmem:[#allocation4 + $0x18] sm:$0xff]  ;;  %v1055_v18 = vld [vmem:[#allocation4 + $0x10] sm:$0xff] }
0x19a5   :  { %1078 = vmatpush.msrb.mxu1 %v1056_v17 }
0x19a6   :  { %1230 = vtanh.f32 %v938_v20  ;;  %v1054_v20 = vld [vmem:[#allocation4 + $0x8] sm:$0xff] }
0x19a7   :  { %1232 = vtanh.f32 %v550_v31  ;;  %1079 = vmatpush.msrb.mxu1 %v1055_v18  ;;  %v1087_v31 = vld [vmem:[%s1752_s9] sm:$0xff] }
0x19a9   :  { %1080 = vmatpush.msrb.mxu1 %v1054_v20 }
0x19ac   :  { %v1231_v21 = vpop.eup %1230 }
0x19ad   :  { %v940_v22 = vmul.f32 %v1231_v21, %v1375_v4  ;;  %v1233_v33 = vpop.eup %1232 }
0x19ae   :  { %v552_v34 = vmul.f32 %v1233_v33, %v1375_v4 }
0x19af   :  { %v941_v27 = vadd.f32 %v940_v22, %v1437_v23  ;;  %v1090_v22 = vld [vmem:[%s1752_s9 + $0x18] sm:$0xff] }
0x19b0   :  { %v553_v35 = vadd.f32 %v552_v34, %v1437_v23  ;;  %1110 = vmatpush.msrb.mxu2 %v1090_v22 }
0x19b1   :  { %944 = vrot.lane.b32.xlu0 %v941_v27, %s1303_s16  ;;  %v942_v36 = vmul.f32 %v941_v27, %v905_v9 }
0x19b2   :  { %v554_v48 = vmul.f32 %v553_v35, %v1616_v49 }
0x1a23   :  { %v945_v32 = vpop.permute.xlu0 %944 }
0x1a24   :  { %v947_v15 = vmul.f32 %v945_v32, %v941_v27  ;;  %v1180_v32 = vld [vmem:[%s1751_s8] ss:$0 sm:$0xff] }
0x1a26   :  { %949 = vrot.lane.b32.xlu1 %v947_v15, %s1304_s3 }
0x1a2e   :  { %556 = vrot.lane.b32.xlu1 %v553_v35, %s1303_s16 }
0x1a98   :  { %v950_v37 = vpop.permute.xlu1 %949 }
0x1a99   :  { %v952_v38 = vadd.f32 %v950_v37, %v942_v36 }
0x1a9b   :  { %1234 = vtanh.f32 %v952_v38 }
0x1aa0   :  { %v557_v63 = vpop.permute.xlu1 %556 }
0x1aa1   :  { %v1235_v16 = vpop.eup %1234  ;;  %v559_v39 = vmul.f32 %v557_v63, %v553_v35 }
0x1aa2   :  { %955 = vrot.lane.b32.xlu2 %v1235_v16, %s1303_s16 }
0x1afc   :  { %v956_v0 = vpop.permute.xlu2 %955 }
0x1afd   :  { %v958_v2 = vmul.f32 %v956_v0, %v941_v27  ;;  %v1089_v27 = vld [vmem:[%s1752_s9 + $0x10] sm:$0xff]  ;;  %s1127_s9 = sshll.u32 %s1754_s11, 4  ;;  %s1128_s9 = int_to_ptr.hbm [resolvable:$true] %s1127_s9 }
0x1afe   :  { %1111 = vmatpush.msrb.mxu2 %v1089_v27 }
0x1aff   :  { %961 = vrot.lane.b32.xlu0 %v958_v2, %s1304_s3 }
0x1b00   :  { %1112 = vmatpush.msrb.mxu2 %v1088_v29 }
0x1b02   :  { %1113 = vmatpush.msrb.mxu2 %v1087_v31 }
0x1b07   :  { %561 = vrot.lane.b32.xlu0 %v559_v39, %s1304_s3 }
0x1b71   :  { %v962_v40 = vpop.permute.xlu0 %961 }
0x1b72   :  { %1166 = vmatmul.msk.f32.vlgmr.msra.gmra.mxu1 %vm170_vm5, %v962_v40 }
0x1b79   :  { %v562_v46 = vpop.permute.xlu0 %561 }
0x1b7a   :  { %v564_v19 = vadd.f32 %v562_v46, %v554_v48 }
0x1bef   :  { %v982_v44 = vpop.f32.mrf.mxu1 }
0x1bf0   :  { %v985_v45 = vadd.f32 %v982_v44, %v672_v43 }
0x1bf2   :  { %1236 = vtanh.f32 %v985_v45 }
0x1bf3   :  { %1238 = vtanh.f32 %v564_v19 }
0x1bf8   :  { %v1237_v47 = vpop.eup %1236 }
0x1bf9   :  { %v987_v50 = vmul.f32 %v1237_v47, %v1375_v4  ;;  %v1239_v25 = vpop.eup %1238 }
0x1bfb   :  { %v988_v24 = vadd.f32 %v987_v50, %v1437_v23 }
0x1bfd   :  { %991 = vrot.lane.b32.xlu2 %v988_v24, %s1303_s16  ;;  %v989_v49 = vmul.f32 %v988_v24, %v952_v38 }
0x1c05   :  { %567 = vrot.lane.b32.xlu2 %v1239_v25, %s1303_s16 }
0x1c57   :  { %v992_v26 = vpop.permute.xlu2 %991 }
0x1c58   :  { %v994_v51 = vmul.f32 %v992_v26, %v988_v24 }
0x1c5a   :  { %996 = vrot.lane.b32.xlu1 %v994_v51, %s1304_s3 }
0x1c5f   :  { %v568_v52 = vpop.permute.xlu2 %567 }
0x1c60   :  { %v570_v53 = vmul.f32 %v568_v52, %v553_v35  ;;  %v1181_v35 = vld [vmem:[%s1753_s10] ss:$0 sm:$0xff] }
0x1c62   :  { %572 = vrot.lane.b32.xlu1 %v570_v53, %s1304_s3 }
0x1ccc   :  { %v997_v54 = vpop.permute.xlu1 %996 }
0x1ccd   :  { %v999_v55 = vadd.f32 %v997_v54, %v989_v49 }
0x1ccf   :  { %1240 = vtanh.f32 %v999_v55 }
0x1cd4   :  { %v573_v56 = vpop.permute.xlu1 %572 }
0x1cd5   :  { %v1241_v57 = vpop.eup %1240  ;;  %576 = vst.msk [vmem:[#allocation3 + $0x38] sm:$0xff] %vm170_vm5, %v573_v56 }
0x1cd6   :  { %1002 = vrot.lane.b32.xlu0 %v1241_v57, %s1303_s16 }
0x1cdc   :  { %v592_v58 = vld [vmem:[#allocation3 + $0x38] sm:$0xff] }
0x1cdd   :  { %1160 = vmatmul.msk.f32.gmra.mxu3 %vm170_vm5, %v592_v58 }
0x1d48   :  { %v1003_v59 = vpop.permute.xlu0 %1002 }
0x1d49   :  { %v1005_v60 = vmul.f32 %v1003_v59, %v988_v24 }
0x1d4b   :  { %1008 = vrot.lane.b32.xlu2 %v1005_v60, %s1304_s3 }
0x1d60   :  { %v663_v1 = vpop.f32.mrf.mxu3 }
0x1d61   :  { %v664_v3 = vadd.f32 %v1602_v30, %v663_v1 }
0x1d63   :  { %v673_v5 = vmul.f32 %v664_v3, %v1375_v4 }
0x1da5   :  { %v1009_v61 = vpop.permute.xlu2 %1008 }
0x1da6   :  { %1167 = vmatmul.msk.f32.vlgmr.msra.gmra.mxu2 %vm170_vm5, %v1009_v61 }
0x1e29   :  { %v1029_v6 = vpop.f32.mrf.mxu2 }
0x1e2a   :  { %v1032_v7 = vadd.f32 %v1029_v6, %v673_v5 }
0x1e2c   :  { %1242 = vtanh.f32 %v1032_v7 }
0x1e32   :  { %v1243_v8 = vpop.eup %1242 }
0x1e33   :  { %v1034_v9 = vmul.f32 %v1243_v8, %v1375_v4  ;;  %v1053_v4 = vld [vmem:[#allocation4] sm:$0xff] }
0x1e34   :  { %1081 = vmatpush.msrb.mxu1 %v1053_v4 }
0x1e35   :  { %v1035_v10 = vadd.f32 %v1034_v9, %v1437_v23 }
0x1e37   :  { %1038 = vrot.lane.b32.xlu0 %v1035_v10, %s1303_s16  ;;  %v1036_v13 = vmul.f32 %v1035_v10, %v999_v55 }
0x1ea9   :  { %v1039_v11 = vpop.permute.xlu0 %1038 }
0x1eaa   :  { %v1041_v12 = vmul.f32 %v1039_v11, %v1035_v10 }
0x1eac   :  { %1043 = vrot.lane.b32.xlu1 %v1041_v12, %s1304_s3 }
0x1f1e   :  { %v1044_v62 = vpop.permute.xlu1 %1043 }
0x1f1f   :  { %v1046_v14 = vadd.f32 %v1044_v62, %v1036_v13 }
0x1f21   :  { %1244 = vtanh.f32 %v1046_v14 }
0x1f27   :  { %v1245_v30 = vpop.eup %1244 }
0x1f28   :  { %1049 = vrot.lane.b32.xlu2 %v1245_v30, %s1303_s16 }
0x1f82   :  { %v1050_v23 = vpop.permute.xlu2 %1049 }
0x1f83   :  { %v1052_v21 = vmul.f32 %v1050_v23, %v1035_v10 }
0x1f85   :  { %1062 = vrot.lane.b32.xlu0 %v1052_v21, %s1304_s3 }
0x1ff7   :  { %v1063_v28 = vpop.permute.xlu0 %1062 }
0x1ff8   :  { %1168 = vmatmul.msk.f32.vlgmr.msrb.gmra.mxu1 %vm170_vm5, %v1063_v28 }
0x2075   :  { %v1083_v15 = vpop.f32.mrf.mxu1 }
0x2076   :  { %v1084_v33 = vadd.f32 %v1180_v32, %v1083_v15 }
0x2078   :  { %v1086_v34 = vmax.f32 %v1084_v33, 0.0 }
0x207a   :  { %1169 = vmatmul.msk.f32.vlgmr.msrb.gmra.mxu2 %vm170_vm5, %v1086_v34 }
0x20fd   :  { %v1115_v36 = vpop.f32.mrf.mxu2 }
0x20fe   :  { %v1116_v37 = vadd.f32 %v1181_v35, %v1115_v36 }
0x2100   :  { %1119 = vst.msk [vmem:[#allocation7] sm:$0xff] %vm1118_vm6, %v1116_v37 }
0x2101   :  { %1130 = dma.vmem_to_hbm [thread:$0]  %s1126_s1, 128, %s1128_s9, [#allocation6]  }
0x2102   :  { %1296 = dma.done.wait [#allocation6], 128  }
0x2103   :  { %1297 = vsyncadd [#allocation6], 4294967168 }
0x2104   :  { %1135 = vsyncpa [#allocation5], 1 }
0x2105   :  { %1136 = vsyncpa [#allocation6], 1 }

</bundles_post_ra>
